<compile_context>
chip_gen: v6e
topology: v6e:2x2x1
jax: 0.10.0
libtpu: 0.0.40
codegen_flags: <defaults>
</compile_context>

<pallas_src>
import functools

import numpy as np
import jax
import jax.numpy as jnp
from jax.experimental import pallas as pl
from jax.experimental.pallas import tpu as pltpu

NET_OUT_DIM = {"resnet18": 512}
LEAKY_SLOPE = 0.01  # F.leaky_relu default negative_slope


def _leaky(x):
    # leaky_relu(x) == max(x, slope*x) for slope in (0, 1)
    return jnp.maximum(x, LEAKY_SLOPE * x)


def _round_up(v, m):
    return -(-v // m) * m


# ----------------------------- Pallas kernels -----------------------------

def encoder_kernel(x_ref, w1_ref, w2_ref, osum_ref, hsum_ref):
    """Synthetic backbone (two bias-free 1x1 convs) + spatial sum-pooling.

    Grid: (2B, S, T); the last axis is the spatial reduction ('arbitrary') and the
    outputs are resident accumulators across it.  Blocks:
      x:      [1, TILE, CPAD] f32   (channel-padded NHWC image tile)
      w1:     [CPAD, MID]     f32
      w2:     [MID, D]        bf16
      osum:   [1, 8, D]       f32   (per-(image, super-tile) sum of leaky(h @ w2), 8 sublanes)
      hsum:   [1, 8, MID]     f32   (per-(image, super-tile) sum of h — pool-first shallow branch)
    The 8-sublane partials are folded (and /HW normalized) once in the head.
    """
    t = pl.program_id(2)

    @pl.when(t == 0)
    def _():
        osum_ref[...] = jnp.zeros_like(osum_ref)
        hsum_ref[...] = jnp.zeros_like(hsum_ref)

    x = x_ref[0]                                                     # [TILE, CPAD] f32
    h = _leaky(jnp.dot(x, w1_ref[...], preferred_element_type=jnp.float32))    # [TILE, MID]
    o = _leaky(jnp.dot(h.astype(jnp.bfloat16), w2_ref[...],
                       preferred_element_type=jnp.float32))                    # [TILE, D]

    tile = x.shape[0]
    # keep 8 sublanes: pure vreg adds, no per-tile cross-sublane (XLU) fold
    osum_ref[0] += jnp.sum(o.reshape(tile // 8, 8, -1), axis=0)
    hsum_ref[0] += jnp.sum(h.reshape(tile // 8, 8, -1), axis=0)


def head_kernel(osum_ref, hsum_ref, center_ref, proto_ref, protoc_ref, tcb_ref, ws_ref,
                ow1, ow2, ow3, sw1, sw2, sw3, tw1e, tw2, cw1e, cw2, qw1, qw2,
                out_ref, *, half_batch, inv_hw, teacher_temp, student_temp):
    """Fused head on the 2B-row (image ++ augimg) batch.

    mean-pool fold + shallow projection + origin_fc + shallow_fc + texture_fc (concat folded)
    + exact similarity + class_fc (concat & prototype-gather folded) + origin_class_fc
    + svdd/align losses + DistillLoss.  Emits one lane-dense [1,128] f32 slab:
      lane 0: distill loss, lanes 1..3: (loss + aug_loss) for origin/class/align.
    """
    f32 = jnp.float32
    bf16 = jnp.bfloat16

    def mm(x, w_ref):
        return jnp.dot(x.astype(bf16), w_ref[...], preferred_element_type=f32)

    def mlp(x, *w_refs):
        for w in w_refs:
            x = _leaky(mm(x, w))
        return x

    # fold the 8-sublane (and super-tile) partial sums from the encoder -> spatial means
    origin_in = jnp.sum(osum_ref[...], axis=1) * inv_hw             # [2B, D]  avgpool(final feat)
    hmean = jnp.sum(hsum_ref[...], axis=1) * inv_hw                 # [2B, MID] avgpool(intermediate)
    shallow_in = mm(hmean, ws_ref)                                  # == avgpool(shallow_conv(h))

    center = center_ref[...]                                        # [1, 64]
    proto = proto_ref[...]                                          # [P, 64]
    proto_c = protoc_ref[...]                                       # [P, 64] = proto @ cw1_hi

    origin = mlp(origin_in, ow1, ow2, ow3)                          # origin_fc  -> [2B, 64]
    shallow = mlp(shallow_in, sw1, sw2, sw3)                        # shallow_fc -> [2B, 64]

    # texture_fc(cat([shallow, shallow - center])) with the concat folded algebraically
    t1 = _leaky(mm(shallow, tw1e) - tcb_ref[...])
    tex = _leaky(mm(t1, tw2))                                       # [2B, 64]

    # exact similarity: sim[:, p] = -||tex - proto[p]||^2   (VPU, no tiny f32 MXU dots)
    n_rows = tex.shape[0]
    n_proto = proto.shape[0]
    lane = jax.lax.broadcasted_iota(jnp.int32, (n_rows, n_proto), 1)
    sim = jnp.zeros((n_rows, n_proto), f32)
    for p in range(n_proto):
        diff = tex - proto[p:p + 1, :]
        neg_d = -jnp.sum(diff * diff, axis=1, keepdims=True)        # [2B, 1]
        sim = jnp.where(lane == p, neg_d, sim)

    # category = argmax(softmax(sim)) == index of first row maximum
    row_max = jnp.max(sim, axis=1, keepdims=True)
    first = jnp.min(jnp.where(sim == row_max, lane, n_proto), axis=1, keepdims=True)

    # class_fc(cat([origin, origin - proto[category]])) with concat + gather folded:
    #   layer1 = origin @ (cw1_lo + cw1_hi) - (proto @ cw1_hi)[category]
    sel_c = jnp.zeros((n_rows, proto_c.shape[1]), f32)
    for p in range(n_proto):
        sel_c = sel_c + jnp.where(first == p, 1.0, 0.0) * proto_c[p:p + 1, :]
    c1 = _leaky(mm(origin, cw1e) - sel_c)
    class_feat = _leaky(mm(c1, cw2))                                # [2B, 64]

    dc = class_feat - center
    class_svdd = jnp.sum(dc * dc, axis=1, keepdims=True)            # [2B, 1]
    oc = mlp(origin, qw1, qw2)                                      # origin_class_fc
    do = oc - center
    origin_svdd = jnp.sum(do * do, axis=1, keepdims=True)           # [2B, 1]
    align = jnp.abs(origin_svdd - class_svdd)

    # loss(image half) + loss(aug half) == sum over both halves / B
    inv_b = 1.0 / float(half_batch)
    l_origin = jnp.sum(origin_svdd) * inv_b
    l_class = jnp.sum(class_svdd) * inv_b
    l_align = jnp.sum(align) * inv_b

    # DistillLoss (teacher = detached student; forward-only so no stop_gradient needed)
    student = sim / student_temp
    tt = sim / teacher_temp
    tt = tt - jnp.max(tt, axis=1, keepdims=True)
    te = jnp.exp(tt)
    q = te / jnp.sum(te, axis=1, keepdims=True)                     # teacher softmax
    m = jnp.max(student, axis=1, keepdims=True)
    ls = student - m - jnp.log(jnp.sum(jnp.exp(student - m), axis=1, keepdims=True))
    q0, q1 = q[:half_batch], q[half_batch:]
    ls0, ls1 = ls[:half_batch], ls[half_batch:]
    l01 = jnp.mean(jnp.sum(-q0 * ls1, axis=1))
    l10 = jnp.mean(jnp.sum(-q1 * ls0, axis=1))
    distill = (l01 + l10) * 0.5

    # lane-dense [1, 128] output slab
    out_lane = jax.lax.broadcasted_iota(jnp.int32, (1, 128), 1)
    row = jnp.where(out_lane == 0, distill,
          jnp.where(out_lane == 1, l_origin,
          jnp.where(out_lane == 2, l_class,
          jnp.where(out_lane == 3, l_align, 0.0))))
    out_ref[...] = row.astype(f32)


# ----------------------------- pallas_call wrappers -----------------------------

_VMEM = pl.BlockSpec(memory_space=pltpu.MemorySpace.VMEM)


def _spatial_plan(hw, cap=1024):
    """Spatial tile (multiple of 16), padded HW, megacore super-split, inner tile count."""
    tile = min(cap, _round_up(hw, 16))
    hw_pad = _round_up(hw, tile)
    n_blocks = hw_pad // tile
    # give both v7x TensorCores several pipeline steps when the batch is tiny
    s_split = 2 if (n_blocks >= 8 and n_blocks % 2 == 0) else 1
    return tile, hw_pad, s_split, n_blocks // s_split


def run_encoder(x, w1, w2, *, tile, s_split, n_t):
    """x: [2B, HW_pad, CPAD] f32 -> (osum, hsum): [2B, 8*S, D] / [2B, 8*S, MID] f32 partial sums."""
    n, _, cpad = x.shape
    mid = w1.shape[1]
    d = w2.shape[1]

    # explicit VMEM budget: double-buffered DMA blocks + in-kernel f32/bf16 intermediates
    block_bytes = (2 * tile * cpad * 4                       # x tiles (f32, 2 buffers)
                   + 2 * (cpad * mid * 4 + mid * d * 2)      # weights (2 buffers)
                   + 2 * 2 * 8 * (d + mid) * 4)              # resident output accumulators
    interm_bytes = tile * mid * 4 + tile * mid * 2 + tile * d * 4   # h f32, h bf16, origin f32
    vmem_limit = int(min(max(2 * (block_bytes + interm_bytes), 8 << 20), 32 << 20))

    grid_spec = pltpu.PrefetchScalarGridSpec(
        num_scalar_prefetch=0,
        grid=(n, s_split, n_t),
        in_specs=[
            pl.BlockSpec((1, tile, cpad), lambda b, s, t: (b, s * n_t + t, 0)),
            pl.BlockSpec((cpad, mid), lambda b, s, t: (0, 0)),
            pl.BlockSpec((mid, d), lambda b, s, t: (0, 0)),
        ],
        out_specs=(
            pl.BlockSpec((1, 8, d), lambda b, s, t: (b, s, 0)),
            pl.BlockSpec((1, 8, mid), lambda b, s, t: (b, s, 0)),
        ),
    )
    osum, hsum = pl.pallas_call(
        encoder_kernel,
        out_shape=(jax.ShapeDtypeStruct((n, 8 * s_split, d), jnp.float32),
                   jax.ShapeDtypeStruct((n, 8 * s_split, mid), jnp.float32)),
        grid_spec=grid_spec,
        compiler_params=pltpu.CompilerParams(
            dimension_semantics=("parallel", "parallel", "arbitrary"),
            vmem_limit_bytes=vmem_limit),
    )(x, w1, w2)
    return osum, hsum


def run_head(osum, hsum, center, proto, proto_c, tcb, ws, *weights,
             half_batch, inv_hw, teacher_temp, student_temp):
    kernel = functools.partial(head_kernel, half_batch=half_batch, inv_hw=inv_hw,
                               teacher_temp=teacher_temp, student_temp=student_temp)
    args = (osum, hsum, center, proto, proto_c, tcb, ws) + weights
    return pl.pallas_call(
        kernel,
        out_shape=jax.ShapeDtypeStruct((1, 128), jnp.float32),
        in_specs=[_VMEM] * len(args),
        out_specs=_VMEM,
    )(*args)


# ----------------------------- model wrapper -----------------------------

class DGADNetPallas:
    def __init__(self, key, *, backbone="resnet18", in_channels=3, mid_channels=64,
                 domain_cnt=3, epochs=20):
        d = NET_OUT_DIM[backbone]
        self.domain_cnt = domain_cnt
        self.mid_channels = mid_channels
        self.in_channels = in_channels
        self.cpad = max(8, _round_up(in_channels, 8))
        ks = jax.random.split(key, 18)

        def lin(k, fan_in, fan_out, dtype=jnp.bfloat16):
            scale = 1.0 / np.sqrt(fan_in)
            w = jax.random.uniform(k, (fan_in, fan_out), jnp.float32, -scale, scale)
            return w.astype(dtype)

        # synthetic encoder + shallow_conv (bias-free 1x1 convs as matmul weights)
        w1 = lin(ks[0], in_channels, mid_channels, dtype=jnp.float32)
        self.enc_w1 = jnp.pad(w1, ((0, self.cpad - in_channels), (0, 0)))   # zero channel pad
        self.enc_w2 = lin(ks[1], mid_channels, d)
        self.shallow_w = lin(ks[2], mid_channels, d)
        self.conv_w = lin(ks[3], d, 1)  # self.conv: defined in __init__ but unused in forward

        # bias-free MLPs (MLP module), bf16 weights / f32 accumulation
        self.origin_fc = (lin(ks[4], d, 1024), lin(ks[5], 1024, 512), lin(ks[6], 512, 64))
        self.shallow_fc = (lin(ks[7], d, 1024), lin(ks[8], 1024, 512), lin(ks[9], 512, 64))
        self.texture_fc = (lin(ks[10], 128, 64), lin(ks[11], 64, 64))
        self.class_fc = (lin(ks[12], 128, 64), lin(ks[13], 64, 64))
        self.origin_class_fc = (lin(ks[14], 64, 64), lin(ks[15], 64, 64))

        # externally-set buffers in the original training code
        self.center = jax.random.normal(ks[16], (1, 64), jnp.float32)
        self.domain_prototype = jax.random.normal(ks[17], (domain_cnt, 64), jnp.float32)

        # concat-fold (bias-free): cat([a, a-b]) @ W == a @ (W_lo + W_hi) - b @ W_hi
        tw1 = self.texture_fc[0].astype(jnp.float32)
        cw1 = self.class_fc[0].astype(jnp.float32)
        self.tw1_eff = (tw1[:64] + tw1[64:]).astype(jnp.bfloat16)
        self.cw1_eff = (cw1[:64] + cw1[64:]).astype(jnp.bfloat16)
        self.tw1_hi = tw1[64:]      # f32; center fold is redone per-forward (buffer may change)
        self.cw1_hi = cw1[64:]      # f32; prototype fold is redone per-forward

        # DistillLoss(int(epochs*0.25), epochs, warmup=0.7, teacher=0.4, student=1)
        warm = int(epochs * 0.25)
        self.student_temp = 1.0
        self.teacher_temp_schedule = np.concatenate(
            (np.linspace(0.7, 0.4, warm), np.ones(epochs - warm) * 0.4))

    def forward(self, image, augimg, epoch):
        # fuse the two forward passes: one batched pass over [image ++ augimg]
        x = jnp.concatenate([image, augimg], axis=0)                   # [2B, C, H, W]
        n, c, h, w = x.shape
        hw = h * w
        half_batch = n // 2

        tile, hw_pad, s_split, n_t = _spatial_plan(hw)

        # NHWC + zero pad (channels -> 8k, HW -> tile multiple); bias-free layers mean the
        # padded rows contribute exactly 0 to both pooling accumulators.
        x_nhwc = jnp.transpose(x, (0, 2, 3, 1)).reshape(n, hw, c).astype(jnp.float32)
        pad_c = self.cpad - c
        pad_hw = hw_pad - hw
        if pad_c or pad_hw:
            x_nhwc = jnp.pad(x_nhwc, ((0, 0), (0, pad_hw), (0, pad_c)))

        # gridded encoder (1x1 convs fused in, spatial sum-pool in 8-sublane partials)
        osum, hsum = run_encoder(x_nhwc, self.enc_w1, self.enc_w2,
                                 tile=tile, s_split=s_split, n_t=n_t)

        # fold the (externally-settable) buffers into the concat-free first layers (tiny XLA dots)
        tcb = self.center @ self.tw1_hi                                # [1, 64]
        proto_c = self.domain_prototype @ self.cw1_hi                  # [P, 64]

        temp = float(self.teacher_temp_schedule[epoch])
        stats = run_head(osum, hsum, self.center, self.domain_prototype, proto_c, tcb,
                         self.shallow_w,
                         *self.origin_fc, *self.shallow_fc,
                         self.tw1_eff, self.texture_fc[1],
                         self.cw1_eff, self.class_fc[1],
                         *self.origin_class_fc,
                         half_batch=half_batch, inv_hw=1.0 / float(hw),
                         teacher_temp=temp, student_temp=self.student_temp)   # [1, 128]

        # [distill, origin_svdd, class_svdd, align] (latter three = loss + aug_loss)
        return stats[0, :4].reshape(4, 1)


# ----------------------------- main -----------------------------

if __name__ == "__main__":
    key = jax.random.PRNGKey(0)
    k_model, k_img, k_aug = jax.random.split(key, 3)

    model = DGADNetPallas(k_model, domain_cnt=3, epochs=20)

    B, C, H, W = 2, 3, 16, 16
    image = jax.random.normal(k_img, (B, C, H, W), jnp.float32)
    augimg = jax.random.normal(k_aug, (B, C, H, W), jnp.float32)

    out = model.forward(image, augimg, epoch=1)
    out = jax.block_until_ready(out)

    assert out.shape == (4, 1), out.shape
    assert bool(jnp.all(jnp.isfinite(out)))
    print("KERNEL_OK")
</pallas_src>

<mosaic_0001>
module attributes {stable_mosaic.version = 11 : i64} {
  func.func @encoder_kernel(%arg0: i32, %arg1: i32, %arg2: i32, %arg3: memref<1x256x8xf32, #tpu.memory_space<vmem>>, %arg4: memref<8x64xf32, #tpu.memory_space<vmem>>, %arg5: memref<64x512xbf16, #tpu.memory_space<vmem>>, %arg6: memref<1x8x512xf32, #tpu.memory_space<vmem>>, %arg7: memref<1x8x64xf32, #tpu.memory_space<vmem>>) attributes {dimension_semantics = [#tpu.dimension_semantics<parallel>, #tpu.dimension_semantics<parallel>, #tpu.dimension_semantics<arbitrary>], iteration_bounds = array<i64: 4, 1, 1>, scalar_prefetch = 0 : i64, scratch_operands = 0 : i64, tpu.core_type = #tpu.core_type<tc>, window_params = [{transform_indices = @transform_0, window_bounds = array<i64: 1, 256, 8>}, {pipeline_mode = #tpu.pipeline_mode<synchronous>, transform_indices = @transform_1, window_bounds = array<i64: 8, 64>}, {pipeline_mode = #tpu.pipeline_mode<synchronous>, transform_indices = @transform_2, window_bounds = array<i64: 64, 512>}, {transform_indices = @transform_3, window_bounds = array<i64: 1, 8, 512>}, {transform_indices = @transform_4, window_bounds = array<i64: 1, 8, 64>}]} {
    %c0_i32 = arith.constant 0 : i32
    %0 = arith.cmpi eq, %arg2, %c0_i32 : i32
    %1 = arith.extui %0 : i1 to i32
    %c0_i32_0 = arith.constant 0 : i32
    %2 = arith.cmpi ne, %1, %c0_i32_0 : i32
    scf.if %2 {
      %cst_24 = arith.constant 0.000000e+00 : f32
      %32 = vector.broadcast %cst_24 : f32 to vector<1x8x512xf32>
      %c0_25 = arith.constant 0 : index
      %c0_26 = arith.constant 0 : index
      %c0_27 = arith.constant 0 : index
      %33 = vector.load %arg6[%c0_25, %c0_26, %c0_27] : memref<1x8x512xf32, #tpu.memory_space<vmem>>, vector<1x8x512xf32>
      tpu.vector_store %arg6[%c0_25, %c0_26, %c0_27], %32 {strides = array<i32>} : memref<1x8x512xf32, #tpu.memory_space<vmem>>, vector<1x8x512xf32>,
      %cst_28 = arith.constant 0.000000e+00 : f32
      %34 = vector.broadcast %cst_28 : f32 to vector<1x8x64xf32>
      %c0_29 = arith.constant 0 : index
      %c0_30 = arith.constant 0 : index
      %c0_31 = arith.constant 0 : index
      %35 = vector.load %arg7[%c0_29, %c0_30, %c0_31] : memref<1x8x64xf32, #tpu.memory_space<vmem>>, vector<1x8x64xf32>
      tpu.vector_store %arg7[%c0_29, %c0_30, %c0_31], %34 {strides = array<i32>} : memref<1x8x64xf32, #tpu.memory_space<vmem>>, vector<1x8x64xf32>,
    } else {
    }
    %c0 = arith.constant 0 : index
    %c0_1 = arith.constant 0 : index
    %c0_2 = arith.constant 0 : index
    %3 = vector.load %arg3[%c0, %c0_1, %c0_2] : memref<1x256x8xf32, #tpu.memory_space<vmem>>, vector<1x256x8xf32>
    %4 = vector.shape_cast %3 : vector<1x256x8xf32> to vector<256x8xf32>
    %c0_3 = arith.constant 0 : index
    %c0_4 = arith.constant 0 : index
    %5 = vector.load %arg4[%c0_3, %c0_4] : memref<8x64xf32, #tpu.memory_space<vmem>>, vector<8x64xf32>
    %cst = arith.constant dense<0.000000e+00> : vector<256x64xf32>
    %6 = tpu.matmul %4, %5, %cst {dimension_numbers = #tpu.dot_dimension_numbers<[1], [0], [0], [1], [0, 0, 1, 1], [], []>} : vector<256x8xf32>, vector<8x64xf32>, vector<256x64xf32> -> vector<256x64xf32>
    %cst_5 = arith.constant 0.00999999977 : f32
    %7 = vector.broadcast %cst_5 : f32 to vector<256x64xf32>
    %8 = arith.mulf %7, %6 : vector<256x64xf32>
    %9 = arith.maximumf %6, %8 : vector<256x64xf32>
    %10 = arith.truncf %9 : vector<256x64xf32> to vector<256x64xbf16>
    %c0_6 = arith.constant 0 : index
    %c0_7 = arith.constant 0 : index
    %11 = vector.load %arg5[%c0_6, %c0_7] : memref<64x512xbf16, #tpu.memory_space<vmem>>, vector<64x512xbf16>
    %cst_8 = arith.constant dense<0.000000e+00> : vector<256x512xf32>
    %12 = tpu.matmul %10, %11, %cst_8 {dimension_numbers = #tpu.dot_dimension_numbers<[1], [0], [0], [1], [0, 0, 1, 1], [], []>} : vector<256x64xbf16>, vector<64x512xbf16>, vector<256x512xf32> -> vector<256x512xf32>
    %cst_9 = arith.constant 0.00999999977 : f32
    %13 = vector.broadcast %cst_9 : f32 to vector<256x512xf32>
    %14 = arith.mulf %13, %12 : vector<256x512xf32>
    %15 = arith.maximumf %12, %14 : vector<256x512xf32>
    %c0_10 = arith.constant 0 : index
    %c0_11 = arith.constant 0 : index
    %c0_12 = arith.constant 0 : index
    %16 = vector.load %arg6[%c0_10, %c0_11, %c0_12] : memref<1x8x512xf32, #tpu.memory_space<vmem>>, vector<1x8x512xf32>
    %17 = vector.shape_cast %16 : vector<1x8x512xf32> to vector<8x512xf32>
    %18 = vector.shape_cast %15 : vector<256x512xf32> to vector<32x8x512xf32>
    %cst_13 = arith.constant dense<0.000000e+00> : vector<8x512xf32>
    %19 = vector.multi_reduction <add>, %18, %cst_13 [0] : vector<32x8x512xf32> to vector<8x512xf32>
    %20 = arith.addf %17, %19 : vector<8x512xf32>
    %c0_14 = arith.constant 0 : index
    %c0_15 = arith.constant 0 : index
    %c0_16 = arith.constant 0 : index
    %21 = vector.load %arg6[%c0_14, %c0_15, %c0_16] : memref<1x8x512xf32, #tpu.memory_space<vmem>>, vector<1x8x512xf32>
    %22 = vector.shape_cast %21 : vector<1x8x512xf32> to vector<8x512xf32>
    %23 = vector.shape_cast %20 : vector<8x512xf32> to vector<1x8x512xf32>
    tpu.vector_store %arg6[%c0_14, %c0_15, %c0_16], %23 {strides = array<i32>} : memref<1x8x512xf32, #tpu.memory_space<vmem>>, vector<1x8x512xf32>,
    %c0_17 = arith.constant 0 : index
    %c0_18 = arith.constant 0 : index
    %c0_19 = arith.constant 0 : index
    %24 = vector.load %arg7[%c0_17, %c0_18, %c0_19] : memref<1x8x64xf32, #tpu.memory_space<vmem>>, vector<1x8x64xf32>
    %25 = vector.shape_cast %24 : vector<1x8x64xf32> to vector<8x64xf32>
    %26 = vector.shape_cast %9 : vector<256x64xf32> to vector<32x8x64xf32>
    %cst_20 = arith.constant dense<0.000000e+00> : vector<8x64xf32>
    %27 = vector.multi_reduction <add>, %26, %cst_20 [0] : vector<32x8x64xf32> to vector<8x64xf32>
    %28 = arith.addf %25, %27 : vector<8x64xf32>
    %c0_21 = arith.constant 0 : index
    %c0_22 = arith.constant 0 : index
    %c0_23 = arith.constant 0 : index
    %29 = vector.load %arg7[%c0_21, %c0_22, %c0_23] : memref<1x8x64xf32, #tpu.memory_space<vmem>>, vector<1x8x64xf32>
    %30 = vector.shape_cast %29 : vector<1x8x64xf32> to vector<8x64xf32>
    %31 = vector.shape_cast %28 : vector<8x64xf32> to vector<1x8x64xf32>
    tpu.vector_store %arg7[%c0_21, %c0_22, %c0_23], %31 {strides = array<i32>} : memref<1x8x64xf32, #tpu.memory_space<vmem>>, vector<1x8x64xf32>,
    return
  }
  func.func @transform_0(%arg0: i32, %arg1: i32, %arg2: i32) -> (i32, i32, i32) {
    %c1_i32 = arith.constant 1 : i32
    %0 = arith.muli %arg1, %c1_i32 : i32
    %1 = arith.addi %0, %arg2 : i32
    %c0_i32 = arith.constant 0 : i32
    %c0_i32_0 = arith.constant 0 : i32
    return %arg0, %1, %c0_i32 : i32, i32, i32
  }
  func.func @transform_1(%arg0: i32, %arg1: i32, %arg2: i32) -> (i32, i32) {
    %c0_i32 = arith.constant 0 : i32
    %c0_i32_0 = arith.constant 0 : i32
    %c0_i32_1 = arith.constant 0 : i32
    return %c0_i32, %c0_i32_0 : i32, i32
  }
  func.func @transform_2(%arg0: i32, %arg1: i32, %arg2: i32) -> (i32, i32) {
    %c0_i32 = arith.constant 0 : i32
    %c0_i32_0 = arith.constant 0 : i32
    %c0_i32_1 = arith.constant 0 : i32
    return %c0_i32, %c0_i32_0 : i32, i32
  }
  func.func @transform_3(%arg0: i32, %arg1: i32, %arg2: i32) -> (i32, i32, i32) {
    %c0_i32 = arith.constant 0 : i32
    %c0_i32_0 = arith.constant 0 : i32
    return %arg0, %arg1, %c0_i32 : i32, i32, i32
  }
  func.func @transform_4(%arg0: i32, %arg1: i32, %arg2: i32) -> (i32, i32, i32) {
    %c0_i32 = arith.constant 0 : i32
    %c0_i32_0 = arith.constant 0 : i32
    return %arg0, %arg1, %c0_i32 : i32, i32, i32
  }
}

</mosaic_0001>

<bundles_post_ra>
// kernel: tpu_custom_call.1
= control target key start
LH: loop header
LB: loop body
LE: loop exit
PB: predicated region body
PF: predicated region fallthrough
CT: control target
= control target key end

     0   :  { %10 = vsyncpa [#allocation3], 0  ;;  %s3104_s0 = inlined_call_operand.vmem [shape: f32[4,256,8], index: 0, kind: input, shape index: {}]   ;;  %s3105_s1 = inlined_call_operand.vmem [shape: f32[8,64], index: 1, kind: input, shape index: {}]   ;;  %s3106_s2 = inlined_call_operand.vmem [shape: bf16[64,512], index: 2, kind: input, shape index: {}]   ;;  %s3107_s3 = inlined_call_operand.hbm [shape: f32[4,8,512], index: 3, kind: output, shape index: {0}]   ;;  %s3108_s4 = inlined_call_operand.hbm [shape: f32[4,8,64], index: 4, kind: output, shape index: {1}]  }
   0x1   :  { %12 = vsyncpa [#allocation3 + $0x1], 0 }
   0x2   :  { %13 = vsyncpa [#allocation5], 0 }
   0x3   :  { %15 = vsyncpa [#allocation5 + $0x1], 0  ;;  %s2242_s15 = smov 0   ;;  %s2244_s16 = smov 0  }
   0x4   :  { %s2246_s17 = smov 0   ;;  %s2248_s18 = smov 0  }
   0x5   :  { %s2250_s19 = smov 0   ;;  %s2252_s20 = smov 0  }
   0x6 LB: > { %s1836_s21 = sadd.s32 4294967295, %s2211_s20   ;;  %s1837_s22 = sadd.s32 4294967294, %s2211_s20   ;;  %s2211_s20 = sphi %s2252_s20, %s21_s20   ;;  %s2207_s19 = sphi %s2250_s19, %s3115_s19   ;;  %s2203_s18 = sphi %s2248_s18, %s3114_s18   ;;  %s2199_s17 = sphi %s2246_s17, %s3113_s17   ;;  %s2195_s16 = sphi %s2244_s16, %s3112_s16   ;;  %s2191_s15 = sphi %s2242_s15, %s3111_s15  }
   0x7   : > { %s40_s23 = sadd.s32 1, %s2207_s19  ;;  %s121_s24 = sadd.s32 1, %s2199_s17 }
   0x8   : > { %p42_p0 = scmp.ge.s32.totalorder %s40_s23, 4  ;;  %p131_p1 = scmp.ne.s32.totalorder %s2199_s17, %s2195_s16 }
   0x9   : > { %p132_p2 = scmp.eq.s32.totalorder %s1836_s21, 3  ;;  %p137_p3 = scmp.ne.s32.totalorder %s2195_s16, %s2191_s15 }
   0xa   : > { %s3117_s23 = smov (%p42_p0, %s40_s23), 0  ;;  %p138_p5 = scmp.eq.s32.totalorder %s1837_s22, 3 }
   0xb   : > { %p2282_p4 = por %p132_p2, %p131_p1  ;;  %s116_s26 = ssub.s32 %s2207_s19, %s3117_s23 }
   0xc   : > { %p1840_p6 = scmp.ge.s32.totalorder %s2211_s20, 1  ;;  %p119_p7 = scmp.eq.s32.totalorder %s116_s26, 0 }
   0xd   : > { %p2289_p8 = por %p138_p5, %p137_p3  ;;  %p205_p9 = scmp.lt.s32.totalorder %s2211_s20, 5 }
   0xe   : > { %s2295_s28 = scalar_select %p119_p7, %s2199_s17, %s121_s24  }
   0xf   : > { %p206_p10 = pnand %p1840_p6, %p205_p9 }
  0x10   : > { %p243_p11 = scmp.lt.s32.totalorder (!%p206_p10), %s2203_s18, 3  ;;  %s1929_s14 = sshll.u32 (!%p206_p10), %s2203_s18, 7 }
  0x11   : > { %209 = sbr.rel (%p206_p10) target bundleno = 577 (0x241), region = 32  ;;  %s2663_s26 = scalar_lea.hbm (!%p206_p10), %s3108_s4, %s1929_s14 }
  0x12   : > { %s2215_s5 = smov (!%p206_p10), [#allocation4]  }
  0x13   : > { %s2109_s6 = sshll.u32 (!%p206_p10), %s2215_s5, 4  ;;  %s2110_s6 = int_to_ptr.vmem [resolvable:$false] %s2109_s6 }
  0x16   : > { %v296_v0 = vld [vmem:[%s3105_s1] sm:$0xff]  ;;  %s244_s7 = scalar_select %p243_p11, %s2203_s18, 3  ;;  %v2086_v2 = vld [vmem:[%s3106_s2 + $0x6c] ss:$16 sps:$4 sm:$0xff]   ;;  %vm297_vm0 = vcmask 64512   ;;  %v2213_v49 = vmov 0  }
  0x17   : > { %1967 = vmatprep.subr.mxu0 %v296_v0  ;;  %2017 = vmatprep.subr.mxu1 %v296_v0  ;;  %v2083_v1 = vld [vmem:[%s3106_s2 + $0x64] ss:$16 sps:$4 sm:$0xff]   ;;  %v2084_v3 = vld [vmem:[%s3106_s2 + $0x68] ss:$16 sps:$4 sm:$0xff]   ;;  %v2092_v4 = vld [vmem:[%s3106_s2 + $0x4c] ss:$16 sps:$4 sm:$0xff]  }
  0x18   : > { %1968 = vmatpush3.msra.mxu0 %v296_v0  ;;  %2018 = vmatpush3.msra.mxu1 %v296_v0  ;;  %s1932_s10 = sshll.u32 %s244_s7, 8  ;;  %v2081_v10 = vld [vmem:[%s3106_s2 + $0x60] ss:$16 sps:$4 sm:$0xff]   ;;  %v2089_v11 = vld [vmem:[%s3106_s2 + $0x44] ss:$16 sps:$4 sm:$0xff]   ;;  %vm262_vm1 = vcmask 523264  }
  0x19   : > { %852 = vmatprep.subr.bf16.mxu1 %v2083_v1  ;;  %1045 = vmatprep.subr.bf16.mxu0 %v2086_v2  ;;  %s2311_s13 = scalar_lea.vmem %s3104_s0, %s1932_s10  ;;  %v2090_v14 = vld [vmem:[%s3106_s2 + $0x48] ss:$16 sps:$4 sm:$0xff]   ;;  %v2087_v19 = vld [vmem:[%s3106_s2 + $0x40] ss:$16 sps:$4 sm:$0xff]   ;;  %v2095_v26 = vld [vmem:[%s3106_s2 + $0x24] ss:$16 sps:$4 sm:$0xff]  }
  0x1a   : > { %v264_v5 = vld [vmem:[%s2311_s13] sm:$0xff]  ;;  %v265_v6 = vld [vmem:[%s2311_s13 + $0x8] sm:$0xff]  ;;  %v266_v7 = vld [vmem:[%s2311_s13 + $0x10] sm:$0xff]  ;;  %v2214_v50 = vmov 0.0   ;;  %s2111_s7 = scalar_lea.vmem %s2110_s6, 256 }
  0x1b   : > { %1969 = vmatprep.mubr.msk.f32.mxu0 %vm297_vm0, %v264_v5  ;;  %v267_v8 = vld [vmem:[%s2311_s13 + $0x18] sm:$0xff]  ;;  %v268_v9 = vld [vmem:[%s2311_s13 + $0x20] sm:$0xff]  ;;  %v281_v13 = vld [vmem:[%s2311_s13 + $0x88] sm:$0xff] }
  0x1c   : > { %1970 = vmatmul.mubr.msk.f32.vlgmr.msra.gmra.mxu0 %vm297_vm0, %v265_v6  ;;  %v280_v12 = vld [vmem:[%s2311_s13 + $0x80] sm:$0xff]  ;;  %v282_v15 = vld [vmem:[%s2311_s13 + $0x90] sm:$0xff]  ;;  %v269_v16 = vld [vmem:[%s2311_s13 + $0x28] sm:$0xff] }
  0x1d   : > { %1972 = vmatprep.mubr.msk.f32.mxu0 %vm297_vm0, %v266_v7  ;;  %1046 = vmatpush1.bf16.msra.mxu0 %v2084_v3  ;;  %v270_v17 = vld [vmem:[%s2311_s13 + $0x30] sm:$0xff]  ;;  %v283_v18 = vld [vmem:[%s2311_s13 + $0x98] sm:$0xff]  ;;  %v284_v21 = vld [vmem:[%s2311_s13 + $0xa0] sm:$0xff] }
  0x1e   : > { %1047 = vmatprep.subr.bf16.mxu0 %v2092_v4  ;;  %1993 = vmatprep.mubr.msk.f32.mxu1 %vm297_vm0, %v280_v12  ;;  %v271_v20 = vld [vmem:[%s2311_s13 + $0x38] sm:$0xff]  ;;  %v272_v22 = vld [vmem:[%s2311_s13 + $0x40] sm:$0xff]  ;;  %v285_v23 = vld [vmem:[%s2311_s13 + $0xa8] sm:$0xff] }
  0x1f   : > { %1994 = vmatmul.mubr.msk.f32.vlgmr.msra.gmra.mxu1 %vm297_vm0, %v281_v13  ;;  %v286_v24 = vld [vmem:[%s2311_s13 + $0xb0] sm:$0xff]  ;;  %v2096_v27 = vld [vmem:[%s3106_s2 + $0x28] ss:$16 sps:$4 sm:$0xff]   ;;  %v2098_v28 = vld [vmem:[%s3106_s2 + $0x2c] ss:$16 sps:$4 sm:$0xff]  }
  0x20   : > { %1973 = vmatmul.mubr.msk.f32.gmra.mxu0 %vm297_vm0, %v267_v8  ;;  %1996 = vmatprep.mubr.msk.f32.mxu1 %vm297_vm0, %v282_v15  ;;  %v2093_v25 = vld [vmem:[%s3106_s2 + $0x20] ss:$16 sps:$4 sm:$0xff]   ;;  %v273_v29 = vld [vmem:[%s2311_s13 + $0x48] sm:$0xff]  ;;  %v287_v31 = vld [vmem:[%s2311_s13 + $0xb8] sm:$0xff] }
  0x21   : > { %1975 = vmatprep.mubr.msk.f32.mxu0 %vm297_vm0, %v268_v9  ;;  %853 = vmatpush1.bf16.msra.mxu1 %v2081_v10  ;;  %v274_v30 = vld [vmem:[%s2311_s13 + $0x50] sm:$0xff]  ;;  %v288_v32 = vld [vmem:[%s2311_s13 + $0xc0] sm:$0xff]  ;;  %v275_v33 = vld [vmem:[%s2311_s13 + $0x58] sm:$0xff] }
  0x22   : > { %854 = vmatprep.subr.bf16.mxu1 %v2089_v11  ;;  %1048 = vmatpush1.bf16.msra.mxu0 %v2090_v14  ;;  %v276_v34 = vld [vmem:[%s2311_s13 + $0x60] sm:$0xff]  ;;  %v289_v35 = vld [vmem:[%s2311_s13 + $0xc8] sm:$0xff]  ;;  %v290_v36 = vld [vmem:[%s2311_s13 + $0xd0] sm:$0xff] }
  0x23   : > { %1997 = vmatmul.mubr.msk.f32.gmra.mxu1 %vm297_vm0, %v283_v18  ;;  %1049 = vmatprep.subr.bf16.mxu0 %v2098_v28  ;;  %v277_v37 = vld [vmem:[%s2311_s13 + $0x68] sm:$0xff]  ;;  %v278_v38 = vld [vmem:[%s2311_s13 + $0x70] sm:$0xff]  ;;  %v291_v39 = vld [vmem:[%s2311_s13 + $0xd8] sm:$0xff] }
  0x24   : > { %1976 = vmatmul.mubr.msk.f32.gmra.mxu0 %vm297_vm0, %v269_v16  ;;  %1999 = vmatprep.mubr.msk.f32.mxu1 %vm297_vm0, %v284_v21  ;;  %v292_v40 = vld [vmem:[%s2311_s13 + $0xe0] sm:$0xff]  ;;  %v279_v41 = vld [vmem:[%s2311_s13 + $0x78] sm:$0xff]  ;;  %v293_v42 = vld [vmem:[%s2311_s13 + $0xe8] sm:$0xff] }
  0x25   : > { %1978 = vmatprep.mubr.msk.f32.mxu0 %vm297_vm0, %v270_v17  ;;  %855 = vmatpush1.bf16.msra.mxu1 %v2087_v19  ;;  %v294_v43 = vld [vmem:[%s2311_s13 + $0xf0] sm:$0xff]  ;;  %v295_v44 = vld [vmem:[%s2311_s13 + $0xf8] sm:$0xff]  ;;  %s2422_s13 = sand.u32 1, %s2195_s16  }
  0x26   : > { %856 = vmatprep.subr.bf16.mxu1 %v2095_v26  ;;  %1050 = vmatpush1.bf16.msra.mxu0 %v2096_v27  ;;  %v2101_v45 = vld [vmem:[%s3106_s2 + $0x4] ss:$16 sps:$4 sm:$0xff]   ;;  %v2104_v46 = vld [vmem:[%s3106_s2 + $0xc] ss:$16 sps:$4 sm:$0xff]   ;;  %v2099_v47 = vld [vmem:[%s3106_s2] ss:$16 sps:$4 sm:$0xff]  }
  0x27   : > { %2000 = vmatmul.mubr.msk.f32.gmra.mxu1 %vm297_vm0, %v285_v23  ;;  %v2102_v48 = vld [vmem:[%s3106_s2 + $0x8] ss:$16 sps:$4 sm:$0xff]   ;;  %1051 = vmatprep.subr.bf16.mxu0 %v2104_v46  ;;  %s1842_s11 = sshll.u32 %s2422_s13, 3  ;;  %s1694_s29 = scalar_lea.sflag [#allocation5], %s2422_s13 }
  0x28   : > { %1979 = vmatmul.mubr.msk.f32.gmra.mxu0 %vm297_vm0, %v271_v20  ;;  %2002 = vmatprep.mubr.msk.f32.mxu1 %vm297_vm0, %v286_v24  ;;  %s2425_s12 = scalar_lea.vmem [#allocation4], %s1842_s11 }
  0x29   : > { %1981 = vmatprep.mubr.msk.f32.mxu0 %vm297_vm0, %v272_v22  ;;  %857 = vmatpush1.bf16.msra.mxu1 %v2093_v25  ;;  %263 = vst.msk [vmem:[%s2425_s12] sm:$0xff] %vm262_vm1, %v2214_v50  ;;  %s1724_s21 = sshll.u32 %s2425_s12, 4  ;;  %s1725_s21 = int_to_ptr.vmem [resolvable:$true] %s1724_s21 }
  0x2a   : > { %858 = vmatprep.subr.bf16.mxu1 %v2101_v45  ;;  %1052 = vmatpush1.bf16.msra.mxu0 %v2102_v48  ;;  %s2105_s30 = scalar_lea.vmem %s1725_s21, 128  ;;  %p2112_p1 = scmp.lt.s32.totalorder %s1725_s21, %s2110_s6 }
  0x2b   : > { %2003 = vmatmul.mubr.msk.f32.gmra.mxu1 %vm297_vm0, %v287_v31  ;;  %p2106_p12 = scmp.ne.s32.totalorder %s1725_s21, %s2105_s30  ;;  %p2113_p2 = scmp.lt.s32.totalorder %s2111_s7, %s2105_s30 }
  0x2c   : > { %1982 = vmatmul.mubr.msk.f32.gmra.mxu0 %vm297_vm0, %v273_v29  ;;  %2005 = vmatprep.mubr.msk.f32.mxu1 %vm297_vm0, %v288_v32 }
  0x2d   : > { %1984 = vmatprep.mubr.msk.f32.mxu0 %vm297_vm0, %v274_v30  ;;  %859 = vmatpush1.bf16.msra.mxu1 %v2099_v47  ;;  %p2107_p13 = pnand %p2106_p12, %p2282_p4  ;;  %p2114_p3 = por %p2113_p2, %p2112_p1 }
  0x2f   : > { %2006 = vmatmul.mubr.msk.f32.gmra.mxu1 %vm297_vm0, %v289_v35  ;;  %p2108_p0 = pneg %p2107_p13 }
  0x30   : > { %1985 = vmatmul.mubr.msk.f32.gmra.mxu0 %vm297_vm0, %v275_v33  ;;  %2008 = vmatprep.mubr.msk.f32.mxu1 %vm297_vm0, %v290_v36 }
  0x31   : > { %1987 = vmatprep.mubr.msk.f32.mxu0 %vm297_vm0, %v276_v34  ;;  %p2115_p5 = pnand %p2114_p3, %p2108_p0 }
  0x33   : > { %2009 = vmatmul.mubr.msk.f32.gmra.mxu1 %vm297_vm0, %v291_v39 }
  0x34   : > { %1988 = vmatmul.mubr.msk.f32.gmra.mxu0 %vm297_vm0, %v277_v37  ;;  %2011 = vmatprep.mubr.msk.f32.mxu1 %vm297_vm0, %v292_v40 }
  0x35   : > { %1990 = vmatprep.mubr.msk.f32.mxu0 %vm297_vm0, %v278_v38 }
  0x37   : > { %2012 = vmatmul.mubr.msk.f32.gmra.mxu1 %vm297_vm0, %v293_v42 }
  0x38   : > { %1991 = vmatmul.mubr.msk.f32.gmra.mxu0 %vm297_vm0, %v279_v41  ;;  %2014 = vmatprep.mubr.msk.f32.mxu1 %vm297_vm0, %v294_v43 }
  0x39   : > { %1069 = vmatprep.mubr.bf16.mxu0 %v2213_v49 }
  0x3b   : > { %2015 = vmatmul.mubr.msk.f32.gmra.mxu1 %vm297_vm0, %v295_v44 }
  0x3c   : > { %876 = vmatprep.mubr.bf16.mxu1 %v2213_v49 }
  0xdc   : > { %v1971_v51 = vpop.f32.mrf.mxu0 }
  0xdd   : > { %v620_v52 = vmul.f32 0.01, %v1971_v51 }
  0xde   : > { %v460_v53 = vpop.f32.mrf.mxu0 }
  0xdf   : > { %v619_v54 = vmul.f32 0.01, %v460_v53  ;;  %v652_v56 = vmax.f32 %v1971_v51, %v620_v52  ;;  %v2429_v59 = vpop.f32.mrf.mxu1 }
  0xe0   : > { %v1974_v55 = vpop.f32.mrf.mxu0 }
  0xe1   : > { %v651_v57 = vmax.f32 %v460_v53, %v619_v54  ;;  %v622_v58 = vmul.f32 0.01, %v1974_v55  ;;  %v2432_v0 = vpop.f32.mrf.mxu1  ;;  %v1624_v2 = vsel %vm262_vm1, %v652_v56, 0.0 }
  0xe2   : > { %v470_v60 = vpop.f32.mrf.mxu0 }
  0xe3   : > { %v683_v61 = vpack.c.bf16 %v652_v56, %v651_v57  ;;  %v1623_v62 = vsel %vm262_vm1, %v651_v57, 0.0  ;;  %v621_v63 = vmul.f32 0.01, %v470_v60  ;;  %v654_v3 = vmax.f32 %v1974_v55, %v622_v58  ;;  %v2437_v6 = vpop.f32.mrf.mxu1 }
  0xe4   : > { %v1977_v1 = vpop.f32.mrf.mxu0  ;;  %v1625_v7 = vadd.f32 %v1624_v2, %v1623_v62 }
  0xe5   : > { %v653_v4 = vmax.f32 %v470_v60, %v621_v63  ;;  %v624_v5 = vmul.f32 0.01, %v1977_v1  ;;  %1893 = vmatmul.mubr.msk.bf16.vlgmr.msra.gmra.mxu1 %vm262_vm1, %v683_v61  ;;  %1909 = vmatmul.mubr.msk.bf16.vlgmr.msra.gmra.mxu0 %vm262_vm1, %v683_v61  ;;  %v2442_v12 = vpop.f32.mrf.mxu1  ;;  %v1628_v15 = vsel %vm262_vm1, %v654_v3, 0.0 }
  0xe6   : > { %v480_v8 = vpop.f32.mrf.mxu0  ;;  %886 = vmatprep.mubr.bf16.mxu1 %v2213_v49  ;;  %1079 = vmatprep.mubr.bf16.mxu0 %v2213_v49 }
  0xe7   : > { %v1626_v9 = vsel %vm262_vm1, %v653_v4, 0.0  ;;  %v656_v10 = vmax.f32 %v1977_v1, %v624_v5  ;;  %v623_v11 = vmul.f32 0.01, %v480_v8  ;;  %v2445_v18 = vpop.f32.mrf.mxu1  ;;  %v684_v19 = vpack.c.bf16 %v654_v3, %v653_v4 }
  0xe8   : > { %v1627_v13 = vadd.f32 %v1626_v9, %v1625_v7  ;;  %v1980_v14 = vpop.f32.mrf.mxu0  ;;  %v635_v4 = vmul.f32 0.01, %v2432_v0  ;;  %v636_v9 = vmul.f32 0.01, %v2429_v59 }
  0xe9   : > { %v655_v16 = vmax.f32 %v480_v8, %v623_v11  ;;  %v626_v17 = vmul.f32 0.01, %v1980_v14  ;;  %v1632_v22 = vsel %vm262_vm1, %v656_v10, 0.0  ;;  %v2449_v26 = vpop.f32.mrf.mxu1 }
  0xea   : > { %v1629_v20 = vadd.f32 %v1628_v15, %v1627_v13  ;;  %v490_v21 = vpop.f32.mrf.mxu0 }
  0xeb   : > { %v1630_v23 = vsel %vm262_vm1, %v655_v16, 0.0  ;;  %v658_v24 = vmax.f32 %v1980_v14, %v626_v17  ;;  %v625_v25 = vmul.f32 0.01, %v490_v21  ;;  %v2455_v33 = vpop.f32.mrf.mxu1  ;;  %v685_v42 = vpack.c.bf16 %v656_v10, %v655_v16 }
  0xec   : > { %v1631_v27 = vadd.f32 %v1630_v23, %v1629_v20  ;;  %v1983_v28 = vpop.f32.mrf.mxu0  ;;  %v637_v20 = vmul.f32 0.01, %v2442_v12 }
  0xed   : > { %v657_v29 = vmax.f32 %v490_v21, %v625_v25  ;;  %v628_v30 = vmul.f32 0.01, %v1983_v28  ;;  %1894 = vmatmul.mubr.msk.bf16.gmra.mxu1 %vm262_vm1, %v684_v19  ;;  %1910 = vmatmul.mubr.msk.bf16.gmra.mxu0 %vm262_vm1, %v684_v19  ;;  %v1636_v34 = vsel %vm262_vm1, %v658_v24, 0.0  ;;  %v2461_v45 = vpop.f32.mrf.mxu1  ;;  %v2497_v19 = vmax.f32 %v2432_v0, %v635_v4 }
  0xee   : > { %v1633_v31 = vadd.f32 %v1632_v22, %v1631_v27  ;;  %v500_v32 = vpop.f32.mrf.mxu0  ;;  %896 = vmatprep.mubr.bf16.mxu1 %v2213_v49  ;;  %1089 = vmatprep.mubr.bf16.mxu0 %v2213_v49  ;;  %v2507_v25 = vmax.f32 %v2429_v59, %v636_v9  ;;  %v638_v0 = vmul.f32 0.01, %v2437_v6 }
  0xef   : > { %v1634_v35 = vsel %vm262_vm1, %v657_v29, 0.0  ;;  %v2459_v36 = vmax.f32 %v1983_v28, %v628_v30  ;;  %v627_v37 = vmul.f32 0.01, %v500_v32  ;;  %v2474_v57 = vpop.f32.mrf.mxu1  ;;  %v686_v5 = vpack.c.bf16 %v658_v24, %v657_v29 }
  0xf0   : > { %v1635_v38 = vadd.f32 %v1634_v35, %v1633_v31  ;;  %v1986_v39 = vpop.f32.mrf.mxu0  ;;  %v1654_v28 = vsel %vm262_vm1, %v2497_v19, 0.0  ;;  %v2513_v29 = vmax.f32 %v2442_v12, %v637_v20  ;;  %v639_v30 = vmul.f32 0.01, %v2449_v26 }
  0xf1   : > { %v659_v40 = vmax.f32 %v500_v32, %v627_v37  ;;  %v630_v41 = vmul.f32 0.01, %v1986_v39  ;;  %v1640_v46 = vsel %vm262_vm1, %v2459_v36, 0.0  ;;  %v580_v10 = vpop.f32.mrf.mxu1  ;;  %v1656_v35 = vsel %vm262_vm1, %v2507_v25, 0.0 }
  0xf2   : > { %v1637_v43 = vadd.f32 %v1636_v34, %v1635_v38  ;;  %v510_v44 = vpop.f32.mrf.mxu0  ;;  %v2520_v59 = vmax.f32 %v2437_v6, %v638_v0  ;;  %v640_v37 = vmul.f32 0.01, %v2445_v18  ;;  %v2528_v12 = vmax.f32 %v2449_v26, %v639_v30 }
  0xf3   : > { %v1638_v47 = vsel %vm262_vm1, %v659_v40, 0.0  ;;  %v2466_v48 = vmax.f32 %v1986_v39, %v630_v41  ;;  %v629_v50 = vmul.f32 0.01, %v510_v44  ;;  %v2010_v22 = vpop.f32.mrf.mxu1  ;;  %v687_v34 = vpack.c.bf16 %v2459_v36, %v659_v40 }
  0xf4   : > { %v1639_v51 = vadd.f32 %v1638_v47, %v1637_v43  ;;  %v1989_v52 = vpop.f32.mrf.mxu0  ;;  %v1658_v39 = vsel %vm262_vm1, %v2513_v29, 0.0  ;;  %v641_v36 = vmul.f32 0.01, %v2461_v45  ;;  %v1660_v41 = vsel %vm262_vm1, %v2520_v59, 0.0 }
  0xf5   : > { %v2468_v53 = vmax.f32 %v510_v44, %v629_v50  ;;  %v632_v54 = vmul.f32 0.01, %v1989_v52  ;;  %1895 = vmatmul.mubr.msk.bf16.gmra.mxu1 %vm262_vm1, %v685_v42  ;;  %1911 = vmatmul.mubr.msk.bf16.gmra.mxu0 %vm262_vm1, %v685_v42  ;;  %v1644_v58 = vsel %vm262_vm1, %v2466_v48, 0.0  ;;  %v590_v32 = vpop.f32.mrf.mxu1  ;;  %v2536_v42 = vmax.f32 %v2445_v18, %v640_v37 }
  0xf6   : > { %v1641_v55 = vadd.f32 %v1640_v46, %v1639_v51  ;;  %v520_v56 = vpop.f32.mrf.mxu0  ;;  %906 = vmatprep.mubr.bf16.mxu1 %v2213_v49  ;;  %1099 = vmatprep.mubr.bf16.mxu0 %v2213_v49  ;;  %v642_v43 = vmul.f32 0.01, %v2455_v33  ;;  %v1662_v26 = vsel %vm262_vm1, %v2528_v12, 0.0  ;;  %v2542_v46 = vmax.f32 %v2461_v45, %v641_v36 }
  0xf7   : > { %v1642_v60 = vsel %vm262_vm1, %v2468_v53, 0.0  ;;  %v2480_v61 = vmax.f32 %v1989_v52, %v632_v54  ;;  %v631_v62 = vmul.f32 0.01, %v520_v56  ;;  %v2013_v6 = vpop.f32.mrf.mxu1  ;;  %v643_v47 = vmul.f32 0.01, %v580_v10 }
  0xf8   : > { %v1643_v63 = vadd.f32 %v1642_v60, %v1641_v55  ;;  %v1992_v1 = vpop.f32.mrf.mxu0  ;;  %v688_v52 = vpack.c.bf16 %v2466_v48, %v2468_v53  ;;  %v1664_v54 = vsel %vm262_vm1, %v2536_v42, 0.0  ;;  %v2549_v18 = vmax.f32 %v2455_v33, %v642_v43 }
  0xf9   : > { %v2482_v2 = vmax.f32 %v520_v56, %v631_v62  ;;  %v634_v3 = vmul.f32 0.01, %v1992_v1  ;;  %v1648_v11 = vsel %vm262_vm1, %v2480_v61, 0.0  ;;  %v600_v51 = vpop.f32.mrf.mxu1  ;;  %v644_v55 = vmul.f32 0.01, %v2474_v57 }
  0xfa   : > { %v1645_v7 = vadd.f32 %v1644_v58, %v1643_v63  ;;  %v530_v8 = vpop.f32.mrf.mxu0  ;;  %v1666_v58 = vsel %vm262_vm1, %v2542_v46, 0.0  ;;  %v2556_v45 = vmax.f32 %v580_v10, %v643_v47  ;;  %v645_v60 = vmul.f32 0.01, %v590_v32 }
  0xfb   : > { %v1646_v13 = vsel %vm262_vm1, %v2482_v2, 0.0  ;;  %v2490_v14 = vmax.f32 %v1992_v1, %v634_v3  ;;  %v633_v15 = vmul.f32 0.01, %v530_v8  ;;  %v2016_v33 = vpop.f32.mrf.mxu1  ;;  %v1668_v53 = vsel %vm262_vm1, %v2549_v18, 0.0 }
  0xfc   : > { %v1647_v16 = vadd.f32 %v1646_v13, %v1645_v7  ;;  %v2563_v62 = vmax.f32 %v2474_v57, %v644_v55  ;;  %v646_v63 = vmul.f32 0.01, %v2010_v22  ;;  %v1670_v3 = vsel %vm262_vm1, %v2556_v45, 0.0 }
  0xfd   : > { %v2492_v17 = vmax.f32 %v530_v8, %v633_v15  ;;  %1896 = vmatmul.mubr.msk.bf16.gmra.mxu1 %vm262_vm1, %v686_v5  ;;  %1912 = vmatmul.mubr.msk.bf16.gmra.mxu0 %vm262_vm1, %v686_v5  ;;  %v1652_v23 = vsel %vm262_vm1, %v2490_v14, 0.0  ;;  %v2567_v4 = vmax.f32 %v590_v32, %v645_v60  ;;  %v647_v5 = vmul.f32 0.01, %v600_v51  ;;  %v610_v8 = vpop.f32.mrf.mxu1 }
  0xfe   : > { %v1649_v21 = vadd.f32 %v1648_v11, %v1647_v16  ;;  %916 = vmatprep.mubr.bf16.mxu1 %v2213_v49  ;;  %1109 = vmatprep.mubr.bf16.mxu0 %v2213_v49  ;;  %v689_v9 = vpack.c.bf16 %v2480_v61, %v2482_v2  ;;  %v1672_v10 = vsel %vm262_vm1, %v2563_v62, 0.0  ;;  %v678_v11 = vmax.f32 %v2010_v22, %v646_v63 }
  0xff   : > { %v1650_v24 = vsel %vm262_vm1, %v2492_v17, 0.0  ;;  %v648_v13 = vmul.f32 0.01, %v2013_v6  ;;  %v1674_v15 = vsel %vm262_vm1, %v2567_v4, 0.0  ;;  %v679_v16 = vmax.f32 %v600_v51, %v647_v5 }
 0x100   : > { %v1651_v27 = vadd.f32 %v1650_v24, %v1649_v21  ;;  %v649_v20 = vmul.f32 0.01, %v610_v8  ;;  %v1676_v61 = vsel %vm262_vm1, %v678_v11, 0.0  ;;  %v650_v22 = vmul.f32 0.01, %v2016_v33 }
 0x101   : > { %v680_v2 = vmax.f32 %v2013_v6, %v648_v13  ;;  %v1678_v24 = vsel %vm262_vm1, %v679_v16, 0.0 }
 0x102   : > { %v1653_v31 = vadd.f32 %v1652_v23, %v1651_v27  ;;  %v681_v0 = vmax.f32 %v610_v8, %v649_v20 }
 0x103   : > { %v1680_v30 = vsel %vm262_vm1, %v680_v2, 0.0 }
 0x104   : > { %v1655_v38 = vadd.f32 %v1654_v28, %v1653_v31  ;;  %v690_v28 = vpack.c.bf16 %v2490_v14, %v2492_v17  ;;  %v682_v31 = vmax.f32 %v2016_v33, %v650_v22  ;;  %v1622_v14 = vld [vmem:[%s2425_s12] sm:$0xff] }
 0x105   : > { %1897 = vmatmul.mubr.msk.bf16.gmra.mxu1 %vm262_vm1, %v687_v34  ;;  %1913 = vmatmul.mubr.msk.bf16.gmra.mxu0 %vm262_vm1, %v687_v34  ;;  %v1682_v34 = vsel %vm262_vm1, %v681_v0, 0.0 }
 0x106   : > { %v1657_v40 = vadd.f32 %v1656_v35, %v1655_v38  ;;  %926 = vmatprep.mubr.bf16.mxu1 %v2213_v49  ;;  %1119 = vmatprep.mubr.bf16.mxu0 %v2213_v49  ;;  %v1684_v37 = vsel %vm262_vm1, %v682_v31, 0.0  ;;  %v698_v6 = vpack.c.bf16 %v682_v31, %v681_v0 }
 0x108   : > { %v1659_v44 = vadd.f32 %v1658_v39, %v1657_v40  ;;  %v691_v39 = vpack.c.bf16 %v2507_v25, %v2497_v19  ;;  %v692_v40 = vpack.c.bf16 %v2520_v59, %v2513_v29  ;;  %v693_v19 = vpack.c.bf16 %v2536_v42, %v2528_v12 }
 0x109   : > { %v694_v25 = vpack.c.bf16 %v2549_v18, %v2542_v46  ;;  %v695_v29 = vpack.c.bf16 %v2563_v62, %v2556_v45  ;;  %v696_v59 = vpack.c.bf16 %v678_v11, %v2567_v4  ;;  %v697_v12 = vpack.c.bf16 %v680_v2, %v679_v16 }
 0x10a   : > { %v1661_v50 = vadd.f32 %v1660_v41, %v1659_v44 }
 0x10c   : > { %v1663_v56 = vadd.f32 %v1662_v26, %v1661_v50 }
 0x10d   : > { %1898 = vmatmul.mubr.msk.bf16.gmra.mxu1 %vm262_vm1, %v688_v52  ;;  %1914 = vmatmul.mubr.msk.bf16.gmra.mxu0 %vm262_vm1, %v688_v52 }
 0x10e   : > { %v1665_v48 = vadd.f32 %v1664_v54, %v1663_v56  ;;  %936 = vmatprep.mubr.bf16.mxu1 %v2213_v49  ;;  %1129 = vmatprep.mubr.bf16.mxu0 %v2213_v49 }
 0x110   : > { %v1667_v1 = vadd.f32 %v1666_v58, %v1665_v48 }
 0x112   : > { %v1669_v7 = vadd.f32 %v1668_v53, %v1667_v1 }
 0x114   : > { %v1671_v57 = vadd.f32 %v1670_v3, %v1669_v7 }
 0x115   : > { %1899 = vmatmul.mubr.msk.bf16.gmra.mxu1 %vm262_vm1, %v689_v9  ;;  %1915 = vmatmul.mubr.msk.bf16.gmra.mxu0 %vm262_vm1, %v689_v9 }
 0x116   : > { %v1673_v21 = vadd.f32 %v1672_v10, %v1671_v57  ;;  %946 = vmatprep.mubr.bf16.mxu1 %v2213_v49  ;;  %1139 = vmatprep.mubr.bf16.mxu0 %v2213_v49 }
 0x118   : > { %v1675_v23 = vadd.f32 %v1674_v15, %v1673_v21 }
 0x11a   : > { %v1677_v27 = vadd.f32 %v1676_v61, %v1675_v23 }
 0x11c   : > { %v1679_v32 = vadd.f32 %v1678_v24, %v1677_v27 }
 0x11d   : > { %1900 = vmatmul.mubr.msk.bf16.gmra.mxu1 %vm262_vm1, %v690_v28  ;;  %1916 = vmatmul.mubr.msk.bf16.gmra.mxu0 %vm262_vm1, %v690_v28 }
 0x11e   : > { %v1681_v35 = vadd.f32 %v1680_v30, %v1679_v32  ;;  %956 = vmatprep.mubr.bf16.mxu1 %v2213_v49  ;;  %1149 = vmatprep.mubr.bf16.mxu0 %v2213_v49 }
 0x120   : > { %v1683_v38 = vadd.f32 %v1682_v34, %v1681_v35 }
 0x122   : > { %v1685_v17 = vadd.f32 %v1684_v37, %v1683_v38 }
 0x124   : > { %v1686_v36 = vadd.f32 %v1685_v17, %v1622_v14 }
 0x125   : > { %1901 = vmatmul.mubr.msk.bf16.gmra.mxu1 %vm262_vm1, %v691_v39  ;;  %1917 = vmatmul.mubr.msk.bf16.gmra.mxu0 %vm262_vm1, %v691_v39 }
 0x126   : > { %966 = vmatprep.mubr.bf16.mxu1 %v2213_v49  ;;  %1159 = vmatprep.mubr.bf16.mxu0 %v2213_v49  ;;  %1687 = vst.msk [vmem:[%s2425_s12] sm:$0xff] %vm262_vm1, %v1686_v36 }
 0x12d   : > { %1902 = vmatmul.mubr.msk.bf16.gmra.mxu1 %vm262_vm1, %v692_v40  ;;  %1918 = vmatmul.mubr.msk.bf16.gmra.mxu0 %vm262_vm1, %v692_v40 }
 0x12e   : > { %976 = vmatprep.mubr.bf16.mxu1 %v2213_v49  ;;  %1169 = vmatprep.mubr.bf16.mxu0 %v2213_v49 }
 0x135   : > { %1903 = vmatmul.mubr.msk.bf16.gmra.mxu1 %vm262_vm1, %v693_v19  ;;  %1919 = vmatmul.mubr.msk.bf16.gmra.mxu0 %vm262_vm1, %v693_v19 }
 0x136   : > { %986 = vmatprep.mubr.bf16.mxu1 %v2213_v49  ;;  %1179 = vmatprep.mubr.bf16.mxu0 %v2213_v49 }
 0x13d   : > { %1904 = vmatmul.mubr.msk.bf16.gmra.mxu1 %vm262_vm1, %v694_v25  ;;  %1920 = vmatmul.mubr.msk.bf16.gmra.mxu0 %vm262_vm1, %v694_v25 }
 0x13e   : > { %996 = vmatprep.mubr.bf16.mxu1 %v2213_v49  ;;  %1189 = vmatprep.mubr.bf16.mxu0 %v2213_v49 }
 0x145   : > { %1905 = vmatmul.mubr.msk.bf16.gmra.mxu1 %vm262_vm1, %v695_v29  ;;  %1921 = vmatmul.mubr.msk.bf16.gmra.mxu0 %vm262_vm1, %v695_v29 }
 0x146   : > { %1006 = vmatprep.mubr.bf16.mxu1 %v2213_v49  ;;  %1199 = vmatprep.mubr.bf16.mxu0 %v2213_v49 }
 0x14d   : > { %1906 = vmatmul.mubr.msk.bf16.gmra.mxu1 %vm262_vm1, %v696_v59  ;;  %1922 = vmatmul.mubr.msk.bf16.gmra.mxu0 %vm262_vm1, %v696_v59 }
 0x14e   : > { %1016 = vmatprep.mubr.bf16.mxu1 %v2213_v49  ;;  %1209 = vmatprep.mubr.bf16.mxu0 %v2213_v49 }
 0x155   : > { %1907 = vmatmul.mubr.msk.bf16.gmra.mxu1 %vm262_vm1, %v697_v12  ;;  %1923 = vmatmul.mubr.msk.bf16.gmra.mxu0 %vm262_vm1, %v697_v12 }
 0x156   : > { %1026 = vmatprep.mubr.bf16.mxu1 %v2213_v49  ;;  %1219 = vmatprep.mubr.bf16.mxu0 %v2213_v49 }
 0x15d   : > { %1908 = vmatmul.mubr.msk.bf16.gmra.mxu1 %vm262_vm1, %v698_v6  ;;  %1924 = vmatmul.mubr.msk.bf16.gmra.mxu0 %vm262_vm1, %v698_v6 }
 0x1a5   : > { %v2634_v41 = vpop.f32.mrf.mxu1  ;;  %v2636_v42 = vpop.f32.mrf.mxu0 }
 0x1a7   : > { %v2638_v43 = vpop.f32.mrf.mxu1  ;;  %v2640_v44 = vpop.f32.mrf.mxu0 }
 0x1a9   : > { %v2642_v26 = vpop.f32.mrf.mxu1  ;;  %v2644_v46 = vpop.f32.mrf.mxu0 }
 0x1ab   : > { %v2646_v49 = vpop.f32.mrf.mxu1  ;;  %v2648_v47 = vpop.f32.mrf.mxu0 }
 0x1ad   : > { %v2650_v50 = vpop.f32.mrf.mxu1  ;;  %v2652_v51 = vpop.f32.mrf.mxu0 }
 0x1af   : > { %v2654_v52 = vpop.f32.mrf.mxu1  ;;  %v2656_v54 = vpop.f32.mrf.mxu0 }
 0x1b1   : > { %v2665_v18 = vpop.f32.mrf.mxu1  ;;  %v2667_v55 = vpop.f32.mrf.mxu0 }
 0x1b2   : > { %2118 = shalt.err (!%p2115_p5)
}
 0x1b3   : > { %s2119_s8 = scalar_lea.hbm %s2663_s26, 128  ;;  %s2123_s11 = scalar_lea.hbm %s3108_s4, 512 }
 0x1b4   : > { %p2120_p6 = scmp.ne.s32.totalorder %s2663_s26, %s2119_s8  ;;  %p2124_p10 = scmp.lt.s32.totalorder %s2663_s26, %s3108_s4 }
 0x1b5   : > { %p2125_p11 = scmp.lt.s32.totalorder %s2123_s11, %s2119_s8 }
 0x1b6   : > { %p2121_p7 = pnand %p2120_p6, %p2282_p4 }
 0x1b7   : > { %p2126_p12 = por %p2125_p11, %p2124_p10 }
 0x1b8   : > { %p2122_p9 = pneg %p2121_p7 }
 0x1ba   : > { %p2127_p13 = pnand %p2126_p12, %p2122_p9 }
 0x1bc   : > { %2130 = shalt.err (!%p2127_p13)
}
 0x1bd   : > { %2020 = dma.vmem_to_hbm [thread:$0]  (%p2282_p4), %s1725_s21, 128, %s2663_s26, %s1694_s29   ;;  %v2686_v56 = vpop.f32.mrf.mxu1  ;;  %v2688_v58 = vpop.f32.mrf.mxu0  ;;  %v1234_v13 = vmul.f32 0.01, %v2642_v26  ;;  %v1236_v57 = vmul.f32 0.01, %v2644_v46 }
 0x1be   : > { %v1230_v20 = vmul.f32 0.01, %v2634_v41  ;;  %v1232_v21 = vmul.f32 0.01, %v2636_v42  ;;  %v1231_v61 = vmul.f32 0.01, %v2638_v43 }
 0x1bf   : > { %v2690_v45 = vpop.f32.mrf.mxu1  ;;  %v2692_v60 = vpop.f32.mrf.mxu0  ;;  %v1235_v2 = vmul.f32 0.01, %v2646_v49  ;;  %v1237_v22 = vmul.f32 0.01, %v2648_v47  ;;  %v1233_v0 = vmul.f32 0.01, %v2640_v44  ;;  %v1362_v30 = vmax.f32 %v2642_v26, %v1234_v13 }
 0x1c0   : > { %v1238_v27 = vmul.f32 0.01, %v2650_v50  ;;  %v1240_v28 = vmul.f32 0.01, %v2652_v51  ;;  %v1364_v31 = vmax.f32 %v2644_v46, %v1236_v57  ;;  %v1239_v32 = vmul.f32 0.01, %v2654_v52 }
 0x1c1   : > { %v2694_v48 = vpop.f32.mrf.mxu1  ;;  %v2696_v33 = vpop.f32.mrf.mxu0  ;;  %v1241_v37 = vmul.f32 0.01, %v2656_v54  ;;  %v1242_v38 = vmul.f32 0.01, %v2665_v18  ;;  %v1244_v14 = vmul.f32 0.01, %v2667_v55  ;;  %v1358_v17 = vmax.f32 %v2634_v41, %v1230_v20 }
 0x1c2   : > { %v1360_v39 = vmax.f32 %v2636_v42, %v1232_v21  ;;  %v1363_v36 = vmax.f32 %v2646_v49, %v1235_v2  ;;  %v1365_v40 = vmax.f32 %v2648_v47, %v1237_v22  ;;  %v1359_v29 = vmax.f32 %v2638_v43, %v1231_v61  ;;  %s1841_s21 = sshll.u32 %s2422_s13, 5  ;;  %s1933_s22 = sshll.u32 %s2203_s18, 9 }
 0x1c3   : > { %v2698_v53 = vpop.f32.mrf.mxu1  ;;  %v2700_v62 = vpop.f32.mrf.mxu0  ;;  %v1361_v59 = vmax.f32 %v2640_v44, %v1233_v0  ;;  %v1366_v12 = vmax.f32 %v2650_v50, %v1238_v27  ;;  %v1368_v6 = vmax.f32 %v2652_v51, %v1240_v28  ;;  %v1490_v26 = vadd.f32 %v1362_v30, %v1358_v17  ;;  %s233_s24 = scalar_lea.vmem [#allocation2], %s1841_s21  ;;  %s3063_s5 = scalar_lea.hbm %s3107_s3, %s1933_s22 }
 0x1c4   : > { %v1552_v41 = vadd.f32 %v1364_v31, %v1360_v39  ;;  %v1367_v42 = vmax.f32 %v2654_v52, %v1239_v32  ;;  %v1243_v46 = vmul.f32 0.01, %v2686_v56  ;;  %v1369_v13 = vmax.f32 %v2656_v54, %v1241_v37  ;;  %s1710_s26 = sshll.u32 %s233_s24, 4  ;;  %s1689_s6 = scalar_lea.sflag [#allocation3], %s2422_s13  ;;  %s1711_s26 = int_to_ptr.vmem [resolvable:$true] %s1710_s26 }
 0x1c5   : > { %v2702_v63 = vpop.f32.mrf.mxu1  ;;  %v2704_v1 = vpop.f32.mrf.mxu0  ;;  %v1370_v43 = vmax.f32 %v2665_v18, %v1242_v38  ;;  %v1372_v44 = vmax.f32 %v2667_v55, %v1244_v14  ;;  %v1245_v50 = vmul.f32 0.01, %v2688_v58  ;;  %v1521_v57 = vadd.f32 %v1363_v36, %v1359_v29  ;;  %s2131_s7 = scalar_lea.vmem %s1711_s26, 512  ;;  %s2216_s18 = smov [#allocation2]  }
 0x1c6   : > { %v1583_v51 = vadd.f32 %v1365_v40, %v1361_v59  ;;  %v1246_v20 = vmul.f32 0.01, %v2690_v45  ;;  %v1248_v52 = vmul.f32 0.01, %v2692_v60  ;;  %v1491_v2 = vadd.f32 %v1490_v26, %v1366_v12  ;;  %p2132_p0 = scmp.ne.s32.totalorder %s1711_s26, %s2131_s7  ;;  %s2135_s8 = sshll.u32 %s2216_s18, 4  ;;  %s2136_s8 = int_to_ptr.vmem [resolvable:$false] %s2135_s8 }
 0x1c7   : > { %v2706_v3 = vpop.f32.mrf.mxu1  ;;  %v2708_v4 = vpop.f32.mrf.mxu0  ;;  %v1553_v22 = vadd.f32 %v1552_v41, %v1368_v6  ;;  %v1247_v54 = vmul.f32 0.01, %v2694_v48  ;;  %v1249_v18 = vmul.f32 0.01, %v2696_v33  ;;  %v1522_v0 = vadd.f32 %v1521_v57, %v1367_v42  ;;  %s2137_s9 = scalar_lea.vmem %s2136_s8, 1024  ;;  %p2138_p3 = scmp.lt.s32.totalorder %s1711_s26, %s2136_s8 }
 0x1c8   : > { %v1371_v55 = vmax.f32 %v2686_v56, %v1243_v46  ;;  %v1250_v27 = vmul.f32 0.01, %v2698_v53  ;;  %v1252_v28 = vmul.f32 0.01, %v2700_v62  ;;  %v1584_v32 = vadd.f32 %v1583_v51, %v1369_v13  ;;  %p2133_p1 = pnand %p2132_p0, %p2282_p4  ;;  %p2139_p5 = scmp.lt.s32.totalorder %s2137_s9, %s2131_s7 }
 0x1c9   : > { %v2710_v5 = vpop.f32.mrf.mxu1  ;;  %v2712_v7 = vpop.f32.mrf.mxu0  ;;  %v1492_v37 = vadd.f32 %v1491_v2, %v1370_v43  ;;  %v1554_v38 = vadd.f32 %v1553_v22, %v1372_v44  ;;  %v1373_v14 = vmax.f32 %v2688_v58, %v1245_v50  ;;  %v1374_v17 = vmax.f32 %v2690_v45, %v1246_v20 }
 0x1ca   : > { %v1376_v39 = vmax.f32 %v2692_v60, %v1248_v52  ;;  %v1251_v36 = vmul.f32 0.01, %v2702_v63  ;;  %v1253_v56 = vmul.f32 0.01, %v2704_v1  ;;  %v1375_v59 = vmax.f32 %v2694_v48, %v1247_v54  ;;  %p2134_p2 = pneg %p2133_p1  ;;  %p2140_p6 = por %p2139_p5, %p2138_p3 }
 0x1cb   : > { %v2714_v8 = vpop.f32.mrf.mxu1  ;;  %v2716_v9 = vpop.f32.mrf.mxu0  ;;  %v1377_v12 = vmax.f32 %v2696_v33, %v1249_v18  ;;  %v1254_v6 = vmul.f32 0.01, %v2706_v3  ;;  %v1256_v58 = vmul.f32 0.01, %v2708_v4  ;;  %v1523_v26 = vadd.f32 %v1522_v0, %v1371_v55 }
 0x1cc   : > { %v1378_v45 = vmax.f32 %v2698_v53, %v1250_v27  ;;  %v1380_v60 = vmax.f32 %v2700_v62, %v1252_v28  ;;  %v1255_v41 = vmul.f32 0.01, %v2710_v5  ;;  %v1585_v13 = vadd.f32 %v1584_v32, %v1373_v14  ;;  %p2141_p7 = pnand %p2140_p6, %p2134_p2 }
 0x1cd   : > { %v2718_v10 = vpop.f32.mrf.mxu1  ;;  %v2720_v11 = vpop.f32.mrf.mxu0  ;;  %v1257_v48 = vmul.f32 0.01, %v2712_v7  ;;  %v1258_v33 = vmul.f32 0.01, %v2714_v8  ;;  %v1260_v43 = vmul.f32 0.01, %v2716_v9  ;;  %v1493_v44 = vadd.f32 %v1492_v37, %v1374_v17 }
 0x1ce   : > { %v1555_v50 = vadd.f32 %v1554_v38, %v1376_v39  ;;  %v1379_v57 = vmax.f32 %v2702_v63, %v1251_v36  ;;  %v1381_v53 = vmax.f32 %v2704_v1, %v1253_v56  ;;  %v1524_v20 = vadd.f32 %v1523_v26, %v1375_v59 }
 0x1cf   : > { %v2724_v15 = vpop.f32.mrf.mxu1  ;;  %v2726_v16 = vpop.f32.mrf.mxu0  ;;  %v1586_v52 = vadd.f32 %v1585_v13, %v1377_v12  ;;  %v1382_v2 = vmax.f32 %v2706_v3, %v1254_v6  ;;  %v1384_v22 = vmax.f32 %v2708_v4, %v1256_v58  ;;  %v1494_v54 = vadd.f32 %v1493_v44, %v1378_v45 }
 0x1d0   : > { %v1556_v18 = vadd.f32 %v1555_v50, %v1380_v60  ;;  %v1383_v0 = vmax.f32 %v2710_v5, %v1255_v41  ;;  %v1259_v55 = vmul.f32 0.01, %v2718_v10  ;;  %v1385_v1 = vmax.f32 %v2712_v7, %v1257_v48 }
 0x1d1   : > { %v2733_v23 = vpop.f32.mrf.mxu1  ;;  %v2735_v24 = vpop.f32.mrf.mxu0  ;;  %v1386_v28 = vmax.f32 %v2714_v8, %v1258_v33  ;;  %v1388_v32 = vmax.f32 %v2716_v9, %v1260_v43  ;;  %v1261_v3 = vmul.f32 0.01, %v2720_v11  ;;  %v1525_v37 = vadd.f32 %v1524_v20, %v1379_v57 }
 0x1d2   : > { %v1587_v4 = vadd.f32 %v1586_v52, %v1381_v53  ;;  %v1262_v38 = vmul.f32 0.01, %v2724_v15  ;;  %v1264_v5 = vmul.f32 0.01, %v2726_v16  ;;  %v1495_v39 = vadd.f32 %v1494_v54, %v1382_v2 }
 0x1d3   : > { %v2743_v34 = vpop.f32.mrf.mxu1  ;;  %v2745_v35 = vpop.f32.mrf.mxu0  ;;  %v1557_v36 = vadd.f32 %v1556_v18, %v1384_v22  ;;  %v1263_v7 = vmul.f32 0.01, %v2733_v23  ;;  %v1265_v8 = vmul.f32 0.01, %v2735_v24  ;;  %v1526_v56 = vadd.f32 %v1525_v37, %v1383_v0 }
 0x1d4   : > { %v1387_v9 = vmax.f32 %v2718_v10, %v1259_v55  ;;  %v1266_v59 = vmul.f32 0.01, %v2743_v34  ;;  %v1268_v12 = vmul.f32 0.01, %v2745_v35  ;;  %v1588_v26 = vadd.f32 %v1587_v4, %v1385_v1 }
 0x1d5   : > { %v2754_v19 = vpop.f32.mrf.mxu1  ;;  %v2756_v25 = vpop.f32.mrf.mxu0  ;;  %v1496_v45 = vadd.f32 %v1495_v39, %v1386_v28  ;;  %v1558_v60 = vadd.f32 %v1557_v36, %v1388_v32  ;;  %v1389_v41 = vmax.f32 %v2720_v11, %v1261_v3  ;;  %v1390_v13 = vmax.f32 %v2724_v15, %v1262_v38 }
 0x1d6   : > { %v1392_v48 = vmax.f32 %v2726_v16, %v1264_v5  ;;  %v1267_v33 = vmul.f32 0.01, %v2754_v19  ;;  %v1269_v10 = vmul.f32 0.01, %v2756_v25  ;;  %v1391_v50 = vmax.f32 %v2733_v23, %v1263_v7 }
 0x1d7   : > { %v2764_v49 = vpop.f32.mrf.mxu1  ;;  %v2766_v47 = vpop.f32.mrf.mxu0  ;;  %v1393_v57 = vmax.f32 %v2735_v24, %v1265_v8  ;;  %v1527_v20 = vadd.f32 %v1526_v56, %v1387_v9  ;;  %v1394_v15 = vmax.f32 %v2743_v34, %v1266_v59  ;;  %v1396_v16 = vmax.f32 %v2745_v35, %v1268_v12 }
 0x1d8   : > { %v1270_v53 = vmul.f32 0.01, %v2764_v49  ;;  %v1272_v11 = vmul.f32 0.01, %v2766_v47  ;;  %v1589_v54 = vadd.f32 %v1588_v26, %v1389_v41  ;;  %v1497_v0 = vadd.f32 %v1496_v45, %v1390_v13 }
 0x1d9   : > { %v2774_v21 = vpop.f32.mrf.mxu1  ;;  %v2776_v61 = vpop.f32.mrf.mxu0  ;;  %v1559_v55 = vadd.f32 %v1558_v60, %v1392_v48  ;;  %v1395_v1 = vmax.f32 %v2754_v19, %v1267_v33  ;;  %v1397_v34 = vmax.f32 %v2756_v25, %v1269_v10  ;;  %v1528_v32 = vadd.f32 %v1527_v20, %v1391_v50 }
 0x1da   : > { %v1271_v52 = vmul.f32 0.01, %v2774_v21  ;;  %v1273_v23 = vmul.f32 0.01, %v2776_v61  ;;  %v1590_v3 = vadd.f32 %v1589_v54, %v1393_v57  ;;  %v1398_v37 = vmax.f32 %v2764_v49, %v1270_v53 }
 0x1db   : > { %v2783_v30 = vpop.f32.mrf.mxu1  ;;  %v2785_v31 = vpop.f32.mrf.mxu0  ;;  %v1400_v4 = vmax.f32 %v2766_v47, %v1272_v11  ;;  %v1498_v38 = vadd.f32 %v1497_v0, %v1394_v15  ;;  %v1560_v5 = vadd.f32 %v1559_v55, %v1396_v16  ;;  %v1529_v9 = vadd.f32 %v1528_v32, %v1395_v1 }
 0x1dc   : > { %v1274_v24 = vmul.f32 0.01, %v2783_v30  ;;  %v1276_v18 = vmul.f32 0.01, %v2785_v31  ;;  %v1399_v39 = vmax.f32 %v2774_v21, %v1271_v52  ;;  %v1401_v25 = vmax.f32 %v2776_v61, %v1273_v23 }
 0x1dd   : > { %v2792_v40 = vpop.f32.mrf.mxu1  ;;  %v2794_v29 = vpop.f32.mrf.mxu0  ;;  %v1591_v47 = vadd.f32 %v1590_v3, %v1397_v34  ;;  %v1499_v45 = vadd.f32 %v1498_v38, %v1398_v37  ;;  %v1561_v60 = vadd.f32 %v1560_v5, %v1400_v4 }
 0x1de   : > { %v1275_v36 = vmul.f32 0.01, %v2792_v40  ;;  %v1402_v8 = vmax.f32 %v2783_v30, %v1274_v24  ;;  %v1404_v56 = vmax.f32 %v2785_v31, %v1276_v18  ;;  %v1277_v49 = vmul.f32 0.01, %v2794_v29 }
 0x1df   : > { %v2803_v42 = vpop.f32.mrf.mxu1  ;;  %v2805_v46 = vpop.f32.mrf.mxu0  ;;  %v1530_v41 = vadd.f32 %v1529_v9, %v1399_v39  ;;  %v1592_v50 = vadd.f32 %v1591_v47, %v1401_v25 }
 0x1e0   : > { %v1278_v59 = vmul.f32 0.01, %v2803_v42  ;;  %v1280_v21 = vmul.f32 0.01, %v2805_v46  ;;  %v1403_v31 = vmax.f32 %v2792_v40, %v1275_v36  ;;  %v1500_v57 = vadd.f32 %v1499_v45, %v1402_v8 }
 0x1e1   : > { %v2812_v62 = vpop.f32.mrf.mxu1  ;;  %v2814_v51 = vpop.f32.mrf.mxu0  ;;  %v1562_v53 = vadd.f32 %v1561_v60, %v1404_v56  ;;  %v1405_v11 = vmax.f32 %v2794_v29, %v1277_v49 }
 0x1e2   : > { %v1279_v61 = vmul.f32 0.01, %v2812_v62  ;;  %v1281_v30 = vmul.f32 0.01, %v2814_v51  ;;  %v1406_v20 = vmax.f32 %v2803_v42, %v1278_v59  ;;  %v1408_v15 = vmax.f32 %v2805_v46, %v1280_v21 }
 0x1e3   : > { %v2820_v27 = vpop.f32.mrf.mxu1  ;;  %v2822_v63 = vpop.f32.mrf.mxu0  ;;  %v1531_v0 = vadd.f32 %v1530_v41, %v1403_v31  ;;  %v1593_v32 = vadd.f32 %v1592_v50, %v1405_v11 }
 0x1e4   : > { %v1282_v13 = vmul.f32 0.01, %v2820_v27  ;;  %v1284_v48 = vmul.f32 0.01, %v2822_v63  ;;  %v1407_v23 = vmax.f32 %v2812_v62, %v1279_v61  ;;  %v1409_v24 = vmax.f32 %v2814_v51, %v1281_v30 }
 0x1e5   : > { %v2830_v14 = vpop.f32.mrf.mxu1  ;;  %v2832_v17 = vpop.f32.mrf.mxu0  ;;  %v1501_v37 = vadd.f32 %v1500_v57, %v1406_v20  ;;  %v1563_v4 = vadd.f32 %v1562_v53, %v1408_v15 }
 0x1e6   : > { %v1283_v16 = vmul.f32 0.01, %v2830_v14  ;;  %v1285_v40 = vmul.f32 0.01, %v2832_v17  ;;  %v1410_v42 = vmax.f32 %v2820_v27, %v1282_v13  ;;  %v1412_v46 = vmax.f32 %v2822_v63, %v1284_v48 }
 0x1e7   : > { %v2839_v6 = vpop.f32.mrf.mxu1  ;;  %v2841_v58 = vpop.f32.mrf.mxu0  ;;  %v1532_v39 = vadd.f32 %v1531_v0, %v1407_v23  ;;  %v1594_v36 = vadd.f32 %v1593_v32, %v1409_v24 }
 0x1e8   : > { %v1286_v18 = vmul.f32 0.01, %v2839_v6  ;;  %v1288_v29 = vmul.f32 0.01, %v2841_v58  ;;  %v1411_v38 = vmax.f32 %v2830_v14, %v1283_v16  ;;  %v1413_v27 = vmax.f32 %v2832_v17, %v1285_v40 }
 0x1e9   : > { %v2848_v43 = vpop.f32.mrf.mxu1  ;;  %v2850_v44 = vpop.f32.mrf.mxu0  ;;  %v1502_v56 = vadd.f32 %v1501_v37, %v1410_v42  ;;  %v1564_v49 = vadd.f32 %v1563_v4, %v1412_v46 }
 0x1ea   : > { %v1287_v55 = vmul.f32 0.01, %v2848_v43  ;;  %v1289_v62 = vmul.f32 0.01, %v2850_v44  ;;  %v1414_v25 = vmax.f32 %v2839_v6, %v1286_v18  ;;  %v1416_v8 = vmax.f32 %v2841_v58, %v1288_v29 }
 0x1eb   : > { %v2859_v2 = vpop.f32.mrf.mxu1  ;;  %v2861_v22 = vpop.f32.mrf.mxu0  ;;  %v1533_v60 = vadd.f32 %v1532_v39, %v1411_v38  ;;  %v1595_v58 = vadd.f32 %v1594_v36, %v1413_v27 }
 0x1ec   : > { %v1290_v51 = vmul.f32 0.01, %v2859_v2  ;;  %v1292_v3 = vmul.f32 0.01, %v2861_v22  ;;  %v1415_v9 = vmax.f32 %v2848_v43, %v1287_v55  ;;  %v1417_v17 = vmax.f32 %v2850_v44, %v1289_v62 }
 0x1ed   : > { %v2868_v35 = vpop.f32.mrf.mxu1  ;;  %v2870_v28 = vpop.f32.mrf.mxu0  ;;  %v1503_v31 = vadd.f32 %v1502_v56, %v1414_v25  ;;  %v1565_v13 = vadd.f32 %v1564_v49, %v1416_v8 }
 0x1ee   : > { %v1291_v47 = vmul.f32 0.01, %v2868_v35  ;;  %v1418_v21 = vmax.f32 %v2859_v2, %v1290_v51  ;;  %v1420_v45 = vmax.f32 %v2861_v22, %v1292_v3  ;;  %v1293_v6 = vmul.f32 0.01, %v2870_v28 }
 0x1ef   : > { %v2876_v7 = vpop.f32.mrf.mxu1  ;;  %v2878_v19 = vpop.f32.mrf.mxu0  ;;  %v1534_v48 = vadd.f32 %v1533_v60, %v1415_v9  ;;  %v1596_v20 = vadd.f32 %v1595_v58, %v1417_v17 }
 0x1f0   : > { %v1294_v61 = vmul.f32 0.01, %v2876_v7  ;;  %v1296_v43 = vmul.f32 0.01, %v2878_v19  ;;  %v1419_v22 = vmax.f32 %v2868_v35, %v1291_v47  ;;  %v1504_v15 = vadd.f32 %v1503_v31, %v1418_v21 }
 0x1f1   : > { %v2886_v12 = vpop.f32.mrf.mxu1  ;;  %v2888_v26 = vpop.f32.mrf.mxu0  ;;  %v1566_v16 = vadd.f32 %v1565_v13, %v1420_v45  ;;  %v1421_v40 = vmax.f32 %v2870_v28, %v1293_v6 }
 0x1f2   : > { %v1295_v44 = vmul.f32 0.01, %v2886_v12  ;;  %v1297_v2 = vmul.f32 0.01, %v2888_v26  ;;  %v1422_v23 = vmax.f32 %v2876_v7, %v1294_v61  ;;  %v1424_v24 = vmax.f32 %v2878_v19, %v1296_v43 }
 0x1f3   : > { %v2895_v33 = vpop.f32.mrf.mxu1  ;;  %v2897_v10 = vpop.f32.mrf.mxu0  ;;  %v1535_v32 = vadd.f32 %v1534_v48, %v1419_v22  ;;  %v1597_v37 = vadd.f32 %v1596_v20, %v1421_v40 }
 0x1f4   : > { %v1298_v50 = vmul.f32 0.01, %v2895_v33  ;;  %v1300_v57 = vmul.f32 0.01, %v2897_v10  ;;  %v1423_v42 = vmax.f32 %v2886_v12, %v1295_v44  ;;  %v1425_v46 = vmax.f32 %v2888_v26, %v1297_v2 }
 0x1f5   : > { %v2904_v52 = vpop.f32.mrf.mxu1  ;;  %v2906_v54 = vpop.f32.mrf.mxu0  ;;  %v1505_v38 = vadd.f32 %v1504_v15, %v1422_v23  ;;  %v1567_v27 = vadd.f32 %v1566_v16, %v1424_v24 }
 0x1f6   : > { %v1299_v18 = vmul.f32 0.01, %v2904_v52  ;;  %v1301_v35 = vmul.f32 0.01, %v2906_v54  ;;  %v1426_v7 = vmax.f32 %v2895_v33, %v1298_v50  ;;  %v1428_v19 = vmax.f32 %v2897_v10, %v1300_v57 }
 0x1f7   : > { %v2915_v1 = vpop.f32.mrf.mxu1  ;;  %v2917_v34 = vpop.f32.mrf.mxu0  ;;  %v1536_v25 = vadd.f32 %v1535_v32, %v1423_v42  ;;  %v1598_v8 = vadd.f32 %v1597_v37, %v1425_v46 }
 0x1f8   : > { %v1302_v55 = vmul.f32 0.01, %v2915_v1  ;;  %v1304_v28 = vmul.f32 0.01, %v2917_v34  ;;  %v1427_v39 = vmax.f32 %v2904_v52, %v1299_v18  ;;  %v1429_v33 = vmax.f32 %v2906_v54, %v1301_v35 }
 0x1f9   : > { %v2924_v63 = vpop.f32.mrf.mxu1  ;;  %v2926_v5 = vpop.f32.mrf.mxu0  ;;  %v1506_v9 = vadd.f32 %v1505_v38, %v1426_v7  ;;  %v1568_v47 = vadd.f32 %v1567_v27, %v1428_v19 }
 0x1fa   : > { %v1303_v62 = vmul.f32 0.01, %v2924_v63  ;;  %v1305_v12 = vmul.f32 0.01, %v2926_v5  ;;  %v1430_v56 = vmax.f32 %v2915_v1, %v1302_v55  ;;  %v1432_v49 = vmax.f32 %v2917_v34, %v1304_v28 }
 0x1fb   : > { %v2932_v59 = vpop.f32.mrf.mxu1  ;;  %v2934_v14 = vpop.f32.mrf.mxu0  ;;  %v1537_v58 = vadd.f32 %v1536_v25, %v1427_v39  ;;  %v1599_v34 = vadd.f32 %v1598_v8, %v1429_v33 }
 0x1fc   : > { %v1306_v26 = vmul.f32 0.01, %v2932_v59  ;;  %v1308_v4 = vmul.f32 0.01, %v2934_v14  ;;  %v1431_v17 = vmax.f32 %v2924_v63, %v1303_v62  ;;  %v1433_v54 = vmax.f32 %v2926_v5, %v1305_v12 }
 0x1fd   : > { %v2942_v30 = vpop.f32.mrf.mxu1  ;;  %v2944_v41 = vpop.f32.mrf.mxu0  ;;  %v1507_v13 = vadd.f32 %v1506_v9, %v1430_v56  ;;  %v1569_v44 = vadd.f32 %v1568_v47, %v1432_v49 }
 0x1fe   : > { %v1307_v21 = vmul.f32 0.01, %v2942_v30  ;;  %v1434_v6 = vmax.f32 %v2932_v59, %v1306_v26  ;;  %v1436_v60 = vmax.f32 %v2934_v14, %v1308_v4  ;;  %v1309_v1 = vmul.f32 0.01, %v2944_v41 }
 0x1ff   : > { %v2951_v53 = vpop.f32.mrf.mxu1  ;;  %v2953_v11 = vpop.f32.mrf.mxu0  ;;  %v1538_v2 = vadd.f32 %v1537_v58, %v1431_v17  ;;  %v1600_v20 = vadd.f32 %v1599_v34, %v1433_v54 }
 0x200   : > { %v1310_v61 = vmul.f32 0.01, %v2951_v53  ;;  %v1312_v63 = vmul.f32 0.01, %v2953_v11  ;;  %v1435_v14 = vmax.f32 %v2942_v30, %v1307_v21  ;;  %v1508_v15 = vadd.f32 %v1507_v13, %v1434_v6 }
 0x201   : > { %v2960_v29 = vpop.f32.mrf.mxu1  ;;  %v2962_v0 = vpop.f32.mrf.mxu0  ;;  %v1570_v16 = vadd.f32 %v1569_v44, %v1436_v60  ;;  %v1437_v40 = vmax.f32 %v2944_v41, %v1309_v1 }
 0x202   : > { %v1311_v5 = vmul.f32 0.01, %v2960_v29  ;;  %v1313_v59 = vmul.f32 0.01, %v2962_v0  ;;  %v1438_v23 = vmax.f32 %v2951_v53, %v1310_v61  ;;  %v1440_v24 = vmax.f32 %v2953_v11, %v1312_v63 }
 0x203   : > { %v2971_v51 = vpop.f32.mrf.mxu1  ;;  %v2973_v3 = vpop.f32.mrf.mxu0  ;;  %v1539_v32 = vadd.f32 %v1538_v2, %v1435_v14  ;;  %v1601_v37 = vadd.f32 %v1600_v20, %v1437_v40 }
 0x204   : > { %v1314_v48 = vmul.f32 0.01, %v2971_v51  ;;  %v1316_v22 = vmul.f32 0.01, %v2973_v3  ;;  %v1439_v46 = vmax.f32 %v2960_v29, %v1311_v5  ;;  %v1441_v55 = vmax.f32 %v2962_v0, %v1313_v59 }
 0x205   : > { %v2980_v10 = vpop.f32.mrf.mxu1  ;;  %v2982_v36 = vpop.f32.mrf.mxu0  ;;  %v1509_v26 = vadd.f32 %v1508_v15, %v1438_v23  ;;  %v1571_v4 = vadd.f32 %v1570_v16, %v1440_v24 }
 0x206   : > { %v1315_v18 = vmul.f32 0.01, %v2980_v10  ;;  %v1317_v30 = vmul.f32 0.01, %v2982_v36  ;;  %v1442_v53 = vmax.f32 %v2971_v51, %v1314_v48  ;;  %v1444_v11 = vmax.f32 %v2973_v3, %v1316_v22 }
 0x207   : > { %v2988_v45 = vpop.f32.mrf.mxu1  ;;  %v2990_v52 = vpop.f32.mrf.mxu0  ;;  %v1540_v39 = vadd.f32 %v1539_v32, %v1439_v46  ;;  %v1602_v33 = vadd.f32 %v1601_v37, %v1441_v55 }
 0x208   : > { %v1318_v28 = vmul.f32 0.01, %v2988_v45  ;;  %v1320_v41 = vmul.f32 0.01, %v2990_v52  ;;  %v1443_v38 = vmax.f32 %v2980_v10, %v1315_v18  ;;  %v1445_v51 = vmax.f32 %v2982_v36, %v1317_v30 }
 0x209   : > { %v2998_v43 = vpop.f32.mrf.mxu1  ;;  %v3000_v31 = vpop.f32.mrf.mxu0  ;;  %v1510_v56 = vadd.f32 %v1509_v26, %v1442_v53  ;;  %v1572_v49 = vadd.f32 %v1571_v4, %v1444_v11 }
 0x20a   : > { %v1319_v7 = vmul.f32 0.01, %v2998_v43  ;;  %v1321_v29 = vmul.f32 0.01, %v3000_v31  ;;  %v1446_v25 = vmax.f32 %v2988_v45, %v1318_v28  ;;  %v1448_v8 = vmax.f32 %v2990_v52, %v1320_v41 }
 0x20b   : > { %v3007_v50 = vpop.f32.mrf.mxu1  ;;  %v3009_v57 = vpop.f32.mrf.mxu0  ;;  %v1541_v60 = vadd.f32 %v1540_v39, %v1443_v38  ;;  %v1603_v45 = vadd.f32 %v1602_v33, %v1445_v51 }
 0x20c   : > { %v1322_v0 = vmul.f32 0.01, %v3007_v50  ;;  %v1324_v12 = vmul.f32 0.01, %v3009_v57  ;;  %v1447_v9 = vmax.f32 %v2998_v43, %v1319_v7  ;;  %v1449_v36 = vmax.f32 %v3000_v31, %v1321_v29 }
 0x20d   : > { %v3016_v35 = vpop.f32.mrf.mxu1  ;;  %v3018_v42 = vpop.f32.mrf.mxu0  ;;  %v1511_v61 = vadd.f32 %v1510_v56, %v1446_v25  ;;  %v1573_v63 = vadd.f32 %v1572_v49, %v1448_v8 }
 0x20e   : > { %v1323_v47 = vmul.f32 0.01, %v3016_v35  ;;  %v1450_v21 = vmax.f32 %v3007_v50, %v1322_v0  ;;  %v1452_v54 = vmax.f32 %v3009_v57, %v1324_v12  ;;  %v1325_v6 = vmul.f32 0.01, %v3018_v42 }
 0x20f   : > { %v3027_v19 = vpop.f32.mrf.mxu1  ;;  %v3029_v62 = vpop.f32.mrf.mxu0  ;;  %v1542_v13 = vadd.f32 %v1541_v60, %v1447_v9  ;;  %v1604_v48 = vadd.f32 %v1603_v45, %v1449_v36 }
 0x210   : > { %v1326_v52 = vmul.f32 0.01, %v3027_v19  ;;  %v1328_v1 = vmul.f32 0.01, %v3029_v62  ;;  %v1451_v44 = vmax.f32 %v3016_v35, %v1323_v47  ;;  %v1512_v22 = vadd.f32 %v1511_v61, %v1450_v21 }
 0x211   : > { %v3036_v3 = vpop.f32.mrf.mxu1  ;;  %v3038_v27 = vpop.f32.mrf.mxu0  ;;  %v1574_v50 = vadd.f32 %v1573_v63, %v1452_v54  ;;  %v1453_v57 = vmax.f32 %v3018_v42, %v1325_v6 }
 0x212   : > { %v1327_v43 = vmul.f32 0.01, %v3036_v3  ;;  %v1329_v31 = vmul.f32 0.01, %v3038_v27  ;;  %v1454_v20 = vmax.f32 %v3027_v19, %v1326_v52  ;;  %v1456_v15 = vmax.f32 %v3029_v62, %v1328_v1 }
 0x213   : > { %v1002_v17 = vpop.f32.mrf.mxu1  ;;  %v1195_v10 = vpop.f32.mrf.mxu0  ;;  %v1543_v55 = vadd.f32 %v1542_v13, %v1451_v44  ;;  %v1605_v11 = vadd.f32 %v1604_v48, %v1453_v57 }
 0x214   : > { %v1330_v5 = vmul.f32 0.01, %v1002_v17  ;;  %v1332_v59 = vmul.f32 0.01, %v1195_v10  ;;  %v1455_v18 = vmax.f32 %v3036_v3, %v1327_v43  ;;  %v1457_v30 = vmax.f32 %v3038_v27, %v1329_v31 }
 0x215   : > { %v1004_v58 = vpop.f32.mrf.mxu1  ;;  %v1197_v34 = vpop.f32.mrf.mxu0  ;;  %v1513_v37 = vadd.f32 %v1512_v22, %v1454_v20  ;;  %v1575_v29 = vadd.f32 %v1574_v50, %v1456_v15 }
 0x216   : > { %v1331_v16 = vmul.f32 0.01, %v1004_v58  ;;  %v1333_v40 = vmul.f32 0.01, %v1197_v34  ;;  %v1458_v28 = vmax.f32 %v1002_v17, %v1330_v5  ;;  %v1460_v41 = vmax.f32 %v1195_v10, %v1332_v59 }
 0x217   : > { %v1008_v2 = vpop.f32.mrf.mxu1  ;;  %v1201_v14 = vpop.f32.mrf.mxu0  ;;  %v1544_v38 = vadd.f32 %v1543_v55, %v1455_v18  ;;  %v1606_v51 = vadd.f32 %v1605_v11, %v1457_v30 }
 0x218   : > { %v1334_v35 = vmul.f32 0.01, %v1008_v2  ;;  %v1336_v46 = vmul.f32 0.01, %v1201_v14  ;;  %v1459_v0 = vmax.f32 %v1004_v58, %v1331_v16  ;;  %v1461_v12 = vmax.f32 %v1197_v34, %v1333_v40 }
 0x219   : > { %v1010_v23 = vpop.f32.mrf.mxu1  ;;  %v1203_v24 = vpop.f32.mrf.mxu0  ;;  %v1514_v39 = vadd.f32 %v1513_v37, %v1458_v28  ;;  %v1576_v33 = vadd.f32 %v1575_v29, %v1460_v41 }
 0x21a   : > { %v1335_v32 = vmul.f32 0.01, %v1010_v23  ;;  %v1337_v7 = vmul.f32 0.01, %v1203_v24  ;;  %v1462_v3 = vmax.f32 %v1008_v2, %v1334_v35  ;;  %v1464_v27 = vmax.f32 %v1201_v14, %v1336_v46 }
 0x21b   : > { %v1012_v53 = vpop.f32.mrf.mxu1  ;;  %v1205_v42 = vpop.f32.mrf.mxu0  ;;  %v1545_v36 = vadd.f32 %v1544_v38, %v1459_v0  ;;  %v1607_v21 = vadd.f32 %v1606_v51, %v1461_v12 }
 0x21c   : > { %v1338_v19 = vmul.f32 0.01, %v1012_v53  ;;  %v1340_v62 = vmul.f32 0.01, %v1205_v42  ;;  %v1463_v9 = vmax.f32 %v1010_v23, %v1335_v32  ;;  %v1465_v47 = vmax.f32 %v1203_v24, %v1337_v7 }
 0x21d   : > { %v1014_v26 = vpop.f32.mrf.mxu1  ;;  %v1207_v4 = vpop.f32.mrf.mxu0  ;;  %v1515_v52 = vadd.f32 %v1514_v39, %v1462_v3  ;;  %v1577_v1 = vadd.f32 %v1576_v33, %v1464_v27 }
 0x21e   : > { %v1339_v25 = vmul.f32 0.01, %v1014_v26  ;;  %v1341_v8 = vmul.f32 0.01, %v1207_v4  ;;  %v1466_v17 = vmax.f32 %v1012_v53, %v1338_v19  ;;  %v1468_v10 = vmax.f32 %v1205_v42, %v1340_v62 }
 0x21f   : > { %v1018_v56 = vpop.f32.mrf.mxu1  ;;  %v1211_v49 = vpop.f32.mrf.mxu0  ;;  %v1546_v13 = vadd.f32 %v1545_v36, %v1463_v9  ;;  %v1608_v44 = vadd.f32 %v1607_v21, %v1465_v47 }
 0x220   : > { %v1342_v54 = vmul.f32 0.01, %v1018_v56  ;;  %v1344_v6 = vmul.f32 0.01, %v1211_v49  ;;  %v1467_v61 = vmax.f32 %v1014_v26, %v1339_v25  ;;  %v1469_v63 = vmax.f32 %v1207_v4, %v1341_v8 }
 0x221   : > { %v1020_v60 = vpop.f32.mrf.mxu1  ;;  %v1213_v45 = vpop.f32.mrf.mxu0  ;;  %v1516_v5 = vadd.f32 %v1515_v52, %v1466_v17  ;;  %v1578_v59 = vadd.f32 %v1577_v1, %v1468_v10 }
 0x222   : > { %v1343_v58 = vmul.f32 0.01, %v1020_v60  ;;  %v1345_v34 = vmul.f32 0.01, %v1213_v45  ;;  %v1470_v2 = vmax.f32 %v1018_v56, %v1342_v54  ;;  %v1472_v14 = vmax.f32 %v1211_v49, %v1344_v6 }
 0x223   : > { %v1022_v43 = vpop.f32.mrf.mxu1  ;;  %v1215_v31 = vpop.f32.mrf.mxu0  ;;  %v1547_v23 = vadd.f32 %v1546_v13, %v1467_v61  ;;  %v1609_v24 = vadd.f32 %v1608_v44, %v1469_v63 }
 0x224   : > { %v1346_v48 = vmul.f32 0.01, %v1022_v43  ;;  %v1348_v22 = vmul.f32 0.01, %v1215_v31  ;;  %v1471_v20 = vmax.f32 %v1020_v60, %v1343_v58  ;;  %v1473_v15 = vmax.f32 %v1213_v45, %v1345_v34 }
 0x225   : > { %v1024_v50 = vpop.f32.mrf.mxu1  ;;  %v1217_v57 = vpop.f32.mrf.mxu0  ;;  %v1517_v53 = vadd.f32 %v1516_v5, %v1470_v2  ;;  %v1579_v42 = vadd.f32 %v1578_v59, %v1472_v14 }
 0x226   : > { %v1347_v16 = vmul.f32 0.01, %v1024_v50  ;;  %v1349_v40 = vmul.f32 0.01, %v1217_v57  ;;  %v1474_v18 = vmax.f32 %v1022_v43, %v1346_v48  ;;  %v1476_v30 = vmax.f32 %v1215_v31, %v1348_v22 }
 0x227   : > { %v1028_v35 = vpop.f32.mrf.mxu1  ;;  %v1221_v46 = vpop.f32.mrf.mxu0  ;;  %v1548_v19 = vadd.f32 %v1547_v23, %v1471_v20  ;;  %v1610_v62 = vadd.f32 %v1609_v24, %v1473_v15 }
 0x228   : > { %v1475_v55 = vmax.f32 %v1024_v50, %v1347_v16  ;;  %v1477_v28 = vmax.f32 %v1217_v57, %v1349_v40  ;;  %v1350_v41 = vmul.f32 0.01, %v1028_v35  ;;  %v1352_v32 = vmul.f32 0.01, %v1221_v46 }
 0x229   : > { %v1030_v11 = vpop.f32.mrf.mxu1  ;;  %v1223_v7 = vpop.f32.mrf.mxu0  ;;  %v1518_v0 = vadd.f32 %v1517_v53, %v1474_v18  ;;  %v1580_v12 = vadd.f32 %v1579_v42, %v1476_v30 }
 0x22a   : > { %v1478_v37 = vmax.f32 %v1028_v35, %v1350_v41  ;;  %v1480_v29 = vmax.f32 %v1221_v46, %v1352_v32  ;;  %v1351_v26 = vmul.f32 0.01, %v1030_v11  ;;  %v1353_v4 = vmul.f32 0.01, %v1223_v7 }
 0x22b   : > { %v1032_v38 = vpop.f32.mrf.mxu1  ;;  %v1225_v51 = vpop.f32.mrf.mxu0  ;;  %v1549_v3 = vadd.f32 %v1548_v19, %v1475_v55  ;;  %v1611_v27 = vadd.f32 %v1610_v62, %v1477_v28 }
 0x22c   : > { %v1354_v39 = vmul.f32 0.01, %v1032_v38  ;;  %v1356_v33 = vmul.f32 0.01, %v1225_v51  ;;  %v1519_v25 = vadd.f32 %v1518_v0, %v1478_v37  ;;  %v1581_v8 = vadd.f32 %v1580_v12, %v1480_v29 }
 0x22d   : > { %v1479_v56 = vmax.f32 %v1030_v11, %v1351_v26  ;;  %v1481_v49 = vmax.f32 %v1223_v7, %v1353_v4  ;;  %v1034_v9 = vpop.f32.mrf.mxu1  ;;  %v1227_v47 = vpop.f32.mrf.mxu0 }
 0x22e   : > { %v1482_v17 = vmax.f32 %v1032_v38, %v1354_v39  ;;  %v1484_v10 = vmax.f32 %v1225_v51, %v1356_v33  ;;  %v1355_v36 = vmul.f32 0.01, %v1034_v9  ;;  %v1357_v21 = vmul.f32 0.01, %v1227_v47 }
 0x22f   : > { %v1550_v54 = vadd.f32 %v1549_v3, %v1479_v56  ;;  %v1612_v6 = vadd.f32 %v1611_v27, %v1481_v49 }
 0x230   : > { %v1520_v60 = vadd.f32 %v1519_v25, %v1482_v17  ;;  %v1582_v45 = vadd.f32 %v1581_v8, %v1484_v10  ;;  %v1483_v52 = vmax.f32 %v1034_v9, %v1355_v36  ;;  %v1485_v1 = vmax.f32 %v1227_v47, %v1357_v21 }
 0x232   : > { %v1551_v58 = vadd.f32 %v1550_v54, %v1483_v52  ;;  %v1613_v34 = vadd.f32 %v1612_v6, %v1485_v1  ;;  %1618 = vst [vmem:[%s233_s24] sm:$0xff] %v1520_v60  ;;  %1620 = vst [vmem:[%s233_s24 + $0x10] sm:$0xff] %v1582_v45 }
 0x234   : > { %1619 = vst [vmem:[%s233_s24 + $0x8] sm:$0xff] %v1551_v58  ;;  %1621 = vst [vmem:[%s233_s24 + $0x18] sm:$0xff] %v1613_v34 }
 0x235   : > { %2144 = shalt.err (!%p2141_p7)
}
 0x236   : > { %s2145_s10 = scalar_lea.hbm %s3063_s5, 512  ;;  %s2149_s12 = scalar_lea.hbm %s3107_s3, 2048 }
 0x237   : > { %p2146_p9 = scmp.ne.s32.totalorder %s3063_s5, %s2145_s10  ;;  %p2150_p12 = scmp.lt.s32.totalorder %s3063_s5, %s3107_s3 }
 0x238   : > { %p2151_p13 = scmp.lt.s32.totalorder %s2149_s12, %s2145_s10 }
 0x239   : > { %p2147_p10 = pnand %p2146_p9, %p2282_p4 }
 0x23a   : > { %p2152_p0 = por %p2151_p13, %p2150_p12 }
 0x23b   : > { %p2148_p11 = pneg %p2147_p10 }
 0x23d   : > { %p2153_p1 = pnand %p2152_p0, %p2148_p11 }
 0x23f   : > { %2156 = shalt.err (!%p2153_p1)
}
 0x240   : > { %2019 = dma.vmem_to_hbm [thread:$0]  (%p2282_p4), %s1711_s26, 512, %s3063_s5, %s1689_s6  }
 0x241 PF: > { %p2030_p2 = scmp.ge.s32.totalorder %s2211_s20, 2  ;;  %s1736_s22 = sand.u32 1, %s2191_s15  }
 0x242   : > { %s1737_s24 = scalar_lea.sflag [#allocation3], %s1736_s22 }
 0x243   : > { %p2024_p3 = pnand %p2030_p2, %p2289_p8 }
 0x245   : > { %p2025_p5 = pneg %p2024_p3 }
 0x247   : > { %2182 = dma.done.wait (%p2025_p5), %s1737_s24, 512  }
 0x248   : > { %2184 = vsyncadd (%p2025_p5), %s1737_s24, 4294966784  ;;  %s1746_s29 = scalar_lea.sflag [#allocation5], %s1736_s22 }
 0x249   : > { %2186 = dma.done.wait (%p2025_p5), %s1746_s29, 128  }
 0x24a   : > { %2188 = vsyncadd (%p2025_p5), %s1746_s29, 4294967168  ;;  %s21_s20 = sadd.s32 1, %s2211_s20   ;;  %s3111_s15 = smov %s2195_s16 }
 0x24b   : > { %p18_p6 = scmp.ge.s32.totalorder %s21_s20, 6   ;;  %s3112_s16 = smov %s2199_s17 }
 0x24c   : > { %s3113_s17 = smov %s2295_s28  ;;  %s3114_s18 = smov %s2207_s19 }
 0x24d   : > { %s3115_s19 = smov %s3117_s23  ;;  %20 = sbr.rel (!%p18_p6) target bundleno = 6 (0x6), region = 88 }
 0x252   :  { %1751 = vsyncpa [#allocation3], 1 }
 0x253   :  { %1753 = vsyncpa [#allocation3 + $0x1], 1 }
 0x254   :  { %1754 = vsyncpa [#allocation5], 1 }
 0x255   :  { %1756 = vsyncpa [#allocation5 + $0x1], 1 }

</bundles_post_ra>
